<compile_context>
chip_gen: v7x
topology: tpu7x:2x2x1
jax: 0.10.0
libtpu: 0.0.40
codegen_flags: <defaults>
</compile_context>

<pallas_src>
import numpy as np

import jax
import jax.numpy as jnp
from jax.experimental import pallas as pl
from jax.experimental.pallas import tpu as pltpu


# --------------------------------------------------------------------- kernel
def _ffn_kernel(x_ref, wi_ref, wo_ref, o_ref, acc_ref):
    # x_ref: (TM, D), wi_ref: (D, TF), wo_ref: (TF, D)
    # o_ref: (TM, D), acc_ref: (TM, D) f32 scratch
    f = pl.program_id(1)

    @pl.when(f == 0)
    def _():
        acc_ref[...] = jnp.zeros_like(acc_ref)

    h = jnp.dot(x_ref[...], wi_ref[...], preferred_element_type=jnp.float32)
    h = jnp.maximum(h, 0.0)  # nn.ReLU
    # TODO(synk): nn.Dropout is identity at inference; no stochastic path here.
    acc_ref[...] += jnp.dot(h.astype(wo_ref.dtype), wo_ref[...],
                            preferred_element_type=jnp.float32)

    @pl.when(f == pl.num_programs(1) - 1)
    def _():
        o_ref[...] = acc_ref[...].astype(o_ref.dtype)


# -------------------------------------------------------------- tile choosers
def _round_up(x, m):
    return -(-x // m) * m


def _pick_tm(m):
    # Small M: one row tile -> single grid step along rows (do not duplicate
    # weight DMA across both v7x TensorCores when the kernel is DMA-bound).
    if m <= 512:
        return max(8, _round_up(m, 8))
    # Large M: prefer a tile that divides M (no wrapper pad/slice pass).
    for cand in (512, 256, 128):
        if m % cand == 0:
            return cand
    return 256  # ragged tail -> pad


def _pick_tf(d_ff):
    for cand in (512, 256, 128):  # multiples of 128 (MXU-friendly on v5e too)
        if d_ff % cand == 0:
            return min(cand, d_ff)
    return d_ff  # fall back: single chunk


# -------------------------------------------------------------------- wrapper
def t5_dense_act_dense(hidden_states, wi, wo, *, tm=None, tf=None):
    """Pallas implementation of T5DenseActDense.forward.

    hidden_states: (..., d_model)
    wi: (d_model, d_ff)   -- transpose of PyTorch self.wi.weight
    wo: (d_ff, d_model)   -- transpose of PyTorch self.wo.weight
    """
    orig_shape = hidden_states.shape
    d_model = orig_shape[-1]
    d_ff = wi.shape[1]
    assert wi.shape == (d_model, d_ff) and wo.shape == (d_ff, d_model)
    assert hidden_states.dtype == wi.dtype == wo.dtype, (
        "hidden_states / wi / wo must share a dtype (f32 or bf16)")

    # Flatten (batch, seq, ...) into a single token axis M.
    m = 1
    for s in orig_shape[:-1]:
        m *= s
    x2 = hidden_states.reshape(m, d_model)

    if tm is None:
        tm = _pick_tm(m)
    if tf is None:
        tf = _pick_tf(d_ff)
    assert d_ff % tf == 0

    m_pad = _round_up(m, tm)
    if m_pad != m:
        x2 = jnp.pad(x2, ((0, m_pad - m), (0, 0)))

    grid = (m_pad // tm, d_ff // tf)

    # VMEM budget: double-buffered x / wi / wo / out blocks + f32 accumulator,
    # with headroom, capped at 48 MiB (safe on v7x's 64 MiB per TensorCore).
    itemsize = jnp.dtype(hidden_states.dtype).itemsize
    footprint = (2 * tm * d_model * itemsize       # x blocks
                 + 2 * d_model * tf * itemsize     # wi panels
                 + 2 * tf * d_model * itemsize     # wo panels
                 + 2 * tm * d_model * itemsize     # out blocks
                 + tm * d_model * 4)               # f32 accumulator scratch
    vmem_limit = int(min(max(2 * footprint, 24 * 1024 * 1024),
                         48 * 1024 * 1024))

    out = pl.pallas_call(
        _ffn_kernel,
        out_shape=jax.ShapeDtypeStruct((m_pad, d_model), hidden_states.dtype),
        grid=grid,
        in_specs=[
            # activations: resident across the d_ff (reduction) axis
            pl.BlockSpec((tm, d_model), lambda i, f: (i, 0)),
            # wi column panel: streamed over f (double-buffered by Pallas)
            pl.BlockSpec((d_model, tf), lambda i, f: (0, f)),
            # wo row panel: streamed over f
            pl.BlockSpec((tf, d_model), lambda i, f: (f, 0)),
        ],
        # lane-dense (d_model multiple of 128) output, resident across f
        out_specs=pl.BlockSpec((tm, d_model), lambda i, f: (i, 0)),
        scratch_shapes=[pltpu.VMEM((tm, d_model), jnp.float32)],
        compiler_params=pltpu.CompilerParams(
            dimension_semantics=("parallel", "arbitrary"),
            vmem_limit_bytes=vmem_limit,
        ),
    )(x2, wi, wo)

    if m_pad != m:
        out = out[:m]
    return out.reshape(orig_shape)


# ------------------------------------------------------------------ reference
def t5_dense_act_dense_reference(hidden_states, wi, wo):
    h = jnp.maximum(hidden_states @ wi, 0.0)
    return h @ wo


# ----------------------------------------------------------------------- main
if __name__ == "__main__":
    # Config-consistent shapes (T5Config: d_model=512, d_ff=2048), small batch.
    B, S = 2, 16
    D_MODEL, D_FF = 512, 2048

    key = jax.random.PRNGKey(0)
    k_x, k_wi, k_wo = jax.random.split(key, 3)

    scale_wi = D_MODEL ** -0.5
    scale_wo = D_FF ** -0.5
    wi = (scale_wi * jax.random.normal(k_wi, (D_MODEL, D_FF))).astype(jnp.float32)
    wo = (scale_wo * jax.random.normal(k_wo, (D_FF, D_MODEL))).astype(jnp.float32)
    hidden_states = jax.random.normal(k_x, (B, S, D_MODEL), jnp.float32)

    # f32 path: matches the PyTorch module numerics (f32 MXU accumulation).
    out = jax.block_until_ready(t5_dense_act_dense(hidden_states, wi, wo))
    ref = jax.block_until_ready(
        t5_dense_act_dense_reference(hidden_states, wi, wo))
    assert out.shape == (B, S, D_MODEL)
    np.testing.assert_allclose(np.asarray(out), np.asarray(ref),
                               rtol=5e-3, atol=5e-3)

    # bf16 path: bf16 operands, f32 MXU accumulation (typical deployed T5).
    out_bf16 = jax.block_until_ready(
        t5_dense_act_dense(hidden_states.astype(jnp.bfloat16),
                           wi.astype(jnp.bfloat16),
                           wo.astype(jnp.bfloat16)))
    np.testing.assert_allclose(np.asarray(out_bf16, dtype=np.float32),
                               np.asarray(ref),
                               rtol=3e-2, atol=3e-2)

    print("KERNEL_OK")
</pallas_src>

<mosaic_0001>
module attributes {stable_mosaic.version = 11 : i64} {
  func.func @_ffn_kernel(%arg0: i32, %arg1: i32, %arg2: memref<32x512xf32, #tpu.memory_space<vmem>>, %arg3: memref<512x512xf32, #tpu.memory_space<vmem>>, %arg4: memref<512x512xf32, #tpu.memory_space<vmem>>, %arg5: memref<32x512xf32, #tpu.memory_space<vmem>>, %arg6: memref<32x512xf32, #tpu.memory_space<vmem>>) attributes {dimension_semantics = [#tpu.dimension_semantics<parallel>, #tpu.dimension_semantics<arbitrary>], iteration_bounds = array<i64: 1, 4>, scalar_prefetch = 0 : i64, scratch_operands = 1 : i64, tpu.core_type = #tpu.core_type<tc>, window_params = [{transform_indices = @transform_0, window_bounds = array<i64: 32, 512>}, {transform_indices = @transform_1, window_bounds = array<i64: 512, 512>}, {transform_indices = @transform_2, window_bounds = array<i64: 512, 512>}, {transform_indices = @transform_3, window_bounds = array<i64: 32, 512>}]} {
    %c0_i32 = arith.constant 0 : i32
    %0 = arith.cmpi eq, %arg1, %c0_i32 : i32
    %1 = arith.extui %0 : i1 to i32
    %c0_i32_0 = arith.constant 0 : i32
    %2 = arith.cmpi ne, %1, %c0_i32_0 : i32
    scf.if %2 {
      %cst_13 = arith.constant 0.000000e+00 : f32
      %16 = vector.broadcast %cst_13 : f32 to vector<32x512xf32>
      %c0_14 = arith.constant 0 : index
      %c0_15 = arith.constant 0 : index
      %17 = vector.load %arg6[%c0_14, %c0_15] : memref<32x512xf32, #tpu.memory_space<vmem>>, vector<32x512xf32>
      tpu.vector_store %arg6[%c0_14, %c0_15], %16 {strides = array<i32>} : memref<32x512xf32, #tpu.memory_space<vmem>>, vector<32x512xf32>,
    } else {
    }
    %c0 = arith.constant 0 : index
    %c0_1 = arith.constant 0 : index
    %3 = vector.load %arg2[%c0, %c0_1] : memref<32x512xf32, #tpu.memory_space<vmem>>, vector<32x512xf32>
    %c0_2 = arith.constant 0 : index
    %c0_3 = arith.constant 0 : index
    %4 = vector.load %arg3[%c0_2, %c0_3] : memref<512x512xf32, #tpu.memory_space<vmem>>, vector<512x512xf32>
    %cst = arith.constant dense<0.000000e+00> : vector<32x512xf32>
    %5 = tpu.matmul %3, %4, %cst {dimension_numbers = #tpu.dot_dimension_numbers<[1], [0], [0], [1], [0, 0, 1, 1], [], []>} : vector<32x512xf32>, vector<512x512xf32>, vector<32x512xf32> -> vector<32x512xf32>
    %cst_4 = arith.constant 0.000000e+00 : f32
    %6 = vector.broadcast %cst_4 : f32 to vector<32x512xf32>
    %7 = arith.maximumf %5, %6 : vector<32x512xf32>
    %c0_5 = arith.constant 0 : index
    %c0_6 = arith.constant 0 : index
    %8 = vector.load %arg6[%c0_5, %c0_6] : memref<32x512xf32, #tpu.memory_space<vmem>>, vector<32x512xf32>
    %c0_7 = arith.constant 0 : index
    %c0_8 = arith.constant 0 : index
    %9 = vector.load %arg4[%c0_7, %c0_8] : memref<512x512xf32, #tpu.memory_space<vmem>>, vector<512x512xf32>
    %cst_9 = arith.constant dense<0.000000e+00> : vector<32x512xf32>
    %10 = tpu.matmul %7, %9, %cst_9 {dimension_numbers = #tpu.dot_dimension_numbers<[1], [0], [0], [1], [0, 0, 1, 1], [], []>} : vector<32x512xf32>, vector<512x512xf32>, vector<32x512xf32> -> vector<32x512xf32>
    %11 = arith.addf %8, %10 : vector<32x512xf32>
    %c0_10 = arith.constant 0 : index
    %c0_11 = arith.constant 0 : index
    %12 = vector.load %arg6[%c0_10, %c0_11] : memref<32x512xf32, #tpu.memory_space<vmem>>, vector<32x512xf32>
    tpu.vector_store %arg6[%c0_10, %c0_11], %11 {strides = array<i32>} : memref<32x512xf32, #tpu.memory_space<vmem>>, vector<32x512xf32>,
    %c3_i32 = arith.constant 3 : i32
    %13 = arith.cmpi eq, %arg1, %c3_i32 : i32
    %14 = arith.extui %13 : i1 to i32
    %c0_i32_12 = arith.constant 0 : i32
    %15 = arith.cmpi ne, %14, %c0_i32_12 : i32
    scf.if %15 {
      %c0_13 = arith.constant 0 : index
      %c0_14 = arith.constant 0 : index
      %16 = vector.load %arg6[%c0_13, %c0_14] : memref<32x512xf32, #tpu.memory_space<vmem>>, vector<32x512xf32>
      %c0_15 = arith.constant 0 : index
      %c0_16 = arith.constant 0 : index
      %17 = vector.load %arg5[%c0_15, %c0_16] : memref<32x512xf32, #tpu.memory_space<vmem>>, vector<32x512xf32>
      tpu.vector_store %arg5[%c0_15, %c0_16], %16 {strides = array<i32>} : memref<32x512xf32, #tpu.memory_space<vmem>>, vector<32x512xf32>,
    } else {
    }
    return
  }
  func.func @transform_0(%arg0: i32, %arg1: i32) -> (i32, i32) {
    %c0_i32 = arith.constant 0 : i32
    %c0_i32_0 = arith.constant 0 : i32
    return %arg0, %c0_i32 : i32, i32
  }
  func.func @transform_1(%arg0: i32, %arg1: i32) -> (i32, i32) {
    %c0_i32 = arith.constant 0 : i32
    %c0_i32_0 = arith.constant 0 : i32
    return %c0_i32, %arg1 : i32, i32
  }
  func.func @transform_2(%arg0: i32, %arg1: i32) -> (i32, i32) {
    %c0_i32 = arith.constant 0 : i32
    %c0_i32_0 = arith.constant 0 : i32
    return %arg1, %c0_i32 : i32, i32
  }
  func.func @transform_3(%arg0: i32, %arg1: i32) -> (i32, i32) {
    %c0_i32 = arith.constant 0 : i32
    %c0_i32_0 = arith.constant 0 : i32
    return %arg0, %c0_i32 : i32, i32
  }
}

</mosaic_0001>

<bundles_post_ra>
// kernel: tpu_custom_call.1
= control target key start
LH: loop header
LB: loop body
LE: loop exit
PB: predicated region body
PF: predicated region fallthrough
CT: control target
= control target key end

     0   :  { %8 = vsyncpa [#allocation4], 0  ;;  %s3363_s0 = inlined_call_operand.hbm [shape: f32[32,512], index: 0, kind: input, shape index: {}]   ;;  %s3364_s1 = inlined_call_operand.hbm [shape: f32[512,2048], index: 1, kind: input, shape index: {}]   ;;  %s3365_s2 = inlined_call_operand.hbm [shape: f32[2048,512], index: 2, kind: input, shape index: {}]   ;;  %s3366_s3 = inlined_call_operand.hbm [shape: f32[32,512], index: 3, kind: output, shape index: {}]  }
   0x1   :  { %9 = vsyncpa [#allocation7], 0 }
   0x2   :  { %11 = vsyncpa [#allocation7 + $0x1], 0 }
   0x3   :  { %12 = vsyncpa [#allocation5], 0  ;;  %s2584_s12 = smov 0   ;;  %s2586_s13 = smov 0  }
   0x4   :  { %s2588_s14 = smov 0   ;;  %s2590_s15 = smov 0  }
   0x5   :  { %s2592_s16 = smov 0   ;;  %s2594_s17 = smov 0  }
   0x6 LB: > { %s27_s18 = sadd.s32 1, %s2548_s16  ;;  %s63_s19 = sadd.s32 1, %s2540_s14  ;;  %s2552_s17 = sphi %s2594_s17, %s18_s17   ;;  %s2548_s16 = sphi %s2592_s16, %s3383_s16   ;;  %s2544_s15 = sphi %s2590_s15, %s3382_s15   ;;  %s2540_s14 = sphi %s2588_s14, %s3381_s14   ;;  %s2536_s13 = sphi %s2586_s13, %s3380_s13   ;;  %s2532_s12 = sphi %s2584_s12, %s3379_s12  }
   0x7   : > { %p28_p0 = scmp.ge.s32.totalorder %s27_s18, 4  ;;  %p70_p1 = scmp.ne.s32.totalorder %s2540_s14, %s2536_s13 }
   0x8   : > { %p71_p2 = scmp.eq.s32.totalorder %s2552_s17, 0  ;;  %p2320_p5 = scmp.lt.s32.totalorder %s2552_s17, 4 }
   0x9   : > { %s3385_s18 = smov (%p28_p0, %s27_s18), 0  ;;  %s169_s22 = sand.u32 1, %s2552_s17  }
   0xa   : > { %p2621_p3 = por %p71_p2, %p70_p1  ;;  %s60_s21 = ssub.s32 %s2548_s16, %s3385_s18 }
   0xb   : > { %p61_p4 = scmp.eq.s32.totalorder %s60_s21, 0  ;;  %s171_s23 = sand.u32 1, %s2540_s14  }
   0xc   : > { %s2633_s25 = sshll.u32 %s171_s23, 11  ;;  %s1749_s26 = sshll.u32 %s2548_s16, 9 }
   0xd   : > { %s2631_s24 = scalar_select %p61_p4, %s2540_s14, %s63_s19  }
   0xe   : > { %s2639_s29 = scalar_lea.hbm %s3364_s1, %s1749_s26  ;;  %s173_s30 = scalar_lea.vmem [#allocation6], %s2633_s25 }
   0xf   : > { %s180_s4 = sshll.u32 %s173_s30, 4  ;;  %p2646_p6 = pnand %p2320_p5, %p2621_p3  ;;  %s2642_s4 = int_to_ptr.vmem [resolvable:$true] %s180_s4 }
  0x10   : > { %s2650_s6 = scalar_lea.sflag [#allocation7], %s169_s22  ;;  %s2380_s7 = scalar_lea.hbm %s2639_s29, 32768 }
  0x11   : > { %p2381_p7 = scmp.ne.s32.totalorder %s2639_s29, %s2380_s7  ;;  %p2382_p8 = pneg %p2646_p6 }
  0x12   : > { %s2385_s10 = scalar_lea.hbm %s3364_s1, 131072  ;;  %p2386_p11 = scmp.lt.u32.totalorder %s2639_s29, %s3364_s1 }
  0x13   : > { %p2383_p9 = pnand %p2382_p8, %p2381_p7  ;;  %p2387_p12 = scmp.lt.u32.totalorder %s2385_s10, %s2380_s7 }
  0x14   : > { %p2389_p0 = scmp.lt.u32.totalorder %s2380_s7, %s2639_s29 }
  0x15   : > { %p2384_p10 = pneg %p2383_p9  ;;  %p2388_p13 = por %p2387_p12, %p2386_p11 }
  0x17   : > { %p2390_p1 = por %p2389_p0, %p2388_p13 }
  0x19   : > { %p2391_p2 = pnand %p2390_p1, %p2384_p10 }
  0x1b   : > { %2394 = shalt.err (!%p2391_p2)
}
  0x1c   : > { %s2395_s20 = scalar_lea.vmem %s2642_s4, 32768  ;;  %s2554_s21 = smov [#allocation6]  }
  0x1d   : > { %p2396_p3 = scmp.ne.s32.totalorder %s2642_s4, %s2395_s20  ;;  %s2400_s22 = sshll.u32 %s2554_s21, 4  ;;  %s2401_s22 = int_to_ptr.vmem [resolvable:$false] %s2400_s22 }
  0x1e   : > { %s2402_s23 = scalar_lea.vmem %s2401_s22, 65536  ;;  %p2403_p7 = scmp.lt.s32.totalorder %s2642_s4, %s2401_s22 }
  0x1f   : > { %p2398_p4 = pnand %p2396_p3, %p2382_p8  ;;  %p2404_p9 = scmp.lt.s32.totalorder %s2402_s23, %s2395_s20 }
  0x21   : > { %p2399_p5 = pneg %p2398_p4  ;;  %p2405_p11 = por %p2404_p9, %p2403_p7 }
  0x23   : > { %p2406_p12 = pnand %p2405_p11, %p2399_p5 }
  0x25   : > { %2409 = shalt.err (!%p2406_p12)
}
  0x26   : > { %s2555_s26 = smov 2048   ;;  %s2556_s27 = smov 512  }
  0x27   : > { %s2557_s28 = smov 32   ;;  %s2681_s30 = sadd.s32 4294967295, %s2552_s17  }
  0x28   : > { %2315 = dma.hbm_to_vmem [thread:$0]  (!%p2646_p6), %s2639_s29, 32768, %s2642_s4, %s2650_s6, %s2555_s26, %s2556_s27, %s2557_s28  }
  0x29   : > { %p76_p10 = scmp.ne.s32.totalorder %s2536_s13, %s2532_s12  ;;  %p3367_p13 = scmp.eq.s32.totalorder %s2681_s30, 0 }
  0x2a   : > { %p1729_p0 = scmp.ge.s32.totalorder %s2552_s17, 1  ;;  %p139_p1 = scmp.lt.s32.totalorder %s2552_s17, 5 }
  0x2b   : > { %p2690_p2 = por %p3367_p13, %p76_p10  ;;  %s2558_s29 = smov [#allocation3]  }
  0x2c   : > { %p2694_p3 = pnand %p1729_p0, %p139_p1  ;;  %s155_s4 = sshll.u32 %s2558_s29, 4  ;;  %s2698_s4 = int_to_ptr.vmem [resolvable:$true] %s155_s4 }
  0x2d   : > { %s3372_s7 = scalar_select %p2690_p2, 1, 0 }
  0x2e   : > { %s3373_s8 = scalar_select %p2694_p3, 1, 0 }
  0x2f   : > { %p2308_p4 = pneg %p2694_p3  ;;  %s1751_s12 = sshll.u32 %s2548_s16, 15 }
  0x30   : > { %s2706_s11 = scalar_lea.hbm %s3365_s2, %s1751_s12  ;;  %s194_s19 = scalar_lea.vmem [#allocation8], %s2633_s25 }
  0x31   : > { %s202_s20 = sshll.u32 %s194_s19, 4  ;;  %p2711_p5 = pnand %p2308_p4, %p3367_p13  ;;  %s2715_s20 = int_to_ptr.vmem [resolvable:$true] %s202_s20 }
  0x32   : > { %s2410_s22 = scalar_lea.hbm %s2706_s11, 32768  ;;  %s2415_s29 = scalar_lea.hbm %s3365_s2, 131072 }
  0x33   : > { %p2411_p7 = scmp.ne.s32.totalorder %s2706_s11, %s2410_s22  ;;  %p2416_p12 = scmp.lt.u32.totalorder %s2706_s11, %s3365_s2 }
  0x34   : > { %p2417_p10 = scmp.lt.u32.totalorder %s2415_s29, %s2410_s22  ;;  %p2419_p1 = scmp.lt.u32.totalorder %s2410_s22, %s2706_s11 }
  0x35   : > { %p2413_p9 = pnand %p2411_p7, %p2382_p8 }
  0x36   : > { %p2418_p0 = por %p2417_p10, %p2416_p12 }
  0x37   : > { %p2414_p11 = pneg %p2413_p9 }
  0x38   : > { %p2420_p4 = por %p2419_p1, %p2418_p0 }
  0x3a   : > { %p2421_p13 = pnand %p2420_p4, %p2414_p11 }
  0x3c   : > { %2424 = shalt.err (!%p2421_p13)
}
  0x3d   : > { %s2425_s9 = scalar_lea.vmem %s2715_s20, 32768  ;;  %s2559_s10 = smov [#allocation8]  }
  0x3e   : > { %p2426_p7 = scmp.ne.s32.totalorder %s2715_s20, %s2425_s9  ;;  %s2430_s19 = sshll.u32 %s2559_s10, 4  ;;  %s2431_s19 = int_to_ptr.vmem [resolvable:$false] %s2430_s19 }
  0x3f   : > { %s2432_s23 = scalar_lea.vmem %s2431_s19, 65536  ;;  %p2433_p3 = scmp.lt.s32.totalorder %s2715_s20, %s2431_s19 }
  0x40   : > { %p2428_p9 = pnand %p2426_p7, %p2382_p8  ;;  %p2434_p12 = scmp.lt.s32.totalorder %s2432_s23, %s2425_s9 }
  0x42   : > { %p2429_p2 = pneg %p2428_p9  ;;  %p2435_p10 = por %p2434_p12, %p2433_p3 }
  0x44   : > { %p2436_p0 = pnand %p2435_p10, %p2429_p2 }
  0x46   : > { %2439 = shalt.err (!%p2436_p0)
}
  0x47   : > { %2318 = dma.hbm_to_vmem [thread:$0]  (!%p2646_p6), %s2706_s11, 32768, %s2715_s20, %s2650_s6, %s2556_s27, %s2556_s27, %s2557_s28  }
  0x48   : > { %s2440_s29 = scalar_lea.hbm %s3363_s0, 2048  ;;  %p2442_p13 = pneg %p2711_p5 }
  0x49   : > { %p2441_p8 = scmp.ne.s32.totalorder %s3363_s0, %s2440_s29  ;;  %p2447_p11 = scmp.lt.u32.totalorder %s2440_s29, %s3363_s0 }
  0x4b   : > { %p2443_p2 = pnand %p2442_p13, %p2441_p8 }
  0x4d   : > { %p2444_p3 = pneg %p2443_p2 }
  0x4f   : > { %p2449_p1 = pnand %p2447_p11, %p2444_p3 }
  0x51   : > { %2452 = shalt.err (!%p2449_p1)
}
  0x52   : > { %s2453_s6 = scalar_lea.vmem %s2698_s4, 2048  ;;  %p2461_p9 = scmp.lt.s32.totalorder %s2698_s4, %s2698_s4 }
  0x53   : > { %p2454_p6 = scmp.ne.s32.totalorder %s2698_s4, %s2453_s6  ;;  %p2462_p12 = scmp.lt.s32.totalorder %s2453_s6, %s2453_s6 }
  0x55   : > { %p2456_p4 = pnand %p2454_p6, %p2442_p13  ;;  %p2463_p10 = por %p2462_p12, %p2461_p9 }
  0x57   : > { %p2457_p7 = pneg %p2456_p4 }
  0x59   : > { %p2464_p0 = pnand %p2463_p10, %p2457_p7 }
  0x5b   : > { %2467 = shalt.err (!%p2464_p0)
}
  0x5c   : > { %2311 = dma.hbm_to_vmem [thread:$0]  (!%p2711_p5), %s3363_s0, 2048, %s2698_s4, [#allocation4], %s2556_s27, %s2556_s27, %s2557_s28  }
  0x5d   : > { %p3375_p8 = scmp.ne.s32.totalorder %s3373_s8, 0 }
  0x5e   : > { %p3376_p13 = scmp.eq.s32.totalorder (!%p3375_p8), %s2681_s30, 0 }
  0x5f   : > { %214 = sbr.rel (%p3375_p8) target bundleno = 792 (0x318), region = 32 }
  0x66   : > { %2519 = dma.done.wait (%p3376_p13), [#allocation4], 2048   ;;  %p3377_p2 = pmov %p3376_p13 }
  0x67   : > { %s220_s21 = sand.u32 1, %s2681_s30   ;;  %s222_s10 = sand.u32 1, %s2536_s13  }
  0x68   : > { %2521 = vsyncadd (%p3377_p2), [#allocation4], 4294965248  ;;  %s1741_s19 = sshll.u32 %s222_s10, 11  ;;  %s221_s23 = scalar_lea.sflag [#allocation7], %s220_s21 }
  0x69   : > { %s2776_s22 = scalar_lea.vmem [#allocation6], %s1741_s19  ;;  %p3378_p3 = scmp.ne.s32.totalorder %s3372_s7, 0 }
  0x6b   : > { %2523 = dma.done.wait (%p3378_p3), %s221_s23, 65536  }
  0x6c   : > { %2525 = vsyncadd (%p3378_p3), %s221_s23, 4294901760  ;;  %s2782_s27 = scalar_lea.vmem [#allocation8], %s1741_s19  ;;  %p1743_p5 = scmp.ne.s32.totalorder %s2544_s15, 0 }
  0x6d   : > { %v2560_v0 = vmov (!%p1743_p5), 0.0  }
  0x6e   : > { %263 = sbr.rel (%p1743_p5) target bundleno = 118 (0x76), region = 48  ;;  %264 = vst [vmem:[#allocation2] sm:$0xff] (!%p1743_p5), %v2560_v0  ;;  %265 = vst [vmem:[#allocation2 + $0x8] sm:$0xff] (!%p1743_p5), %v2560_v0 }
  0x6f   : > { %266 = vst [vmem:[#allocation2 + $0x10] sm:$0xff] (!%p1743_p5), %v2560_v0  ;;  %267 = vst [vmem:[#allocation2 + $0x18] sm:$0xff] (!%p1743_p5), %v2560_v0 }
  0x70   : > { %268 = vst [vmem:[#allocation2 + $0x20] sm:$0xff] (!%p1743_p5), %v2560_v0  ;;  %269 = vst [vmem:[#allocation2 + $0x28] sm:$0xff] (!%p1743_p5), %v2560_v0 }
  0x71   : > { %270 = vst [vmem:[#allocation2 + $0x30] sm:$0xff] (!%p1743_p5), %v2560_v0  ;;  %271 = vst [vmem:[#allocation2 + $0x38] sm:$0xff] (!%p1743_p5), %v2560_v0 }
  0x72   : > { %272 = vst [vmem:[#allocation2 + $0x40] sm:$0xff] (!%p1743_p5), %v2560_v0  ;;  %273 = vst [vmem:[#allocation2 + $0x48] sm:$0xff] (!%p1743_p5), %v2560_v0 }
  0x73   : > { %274 = vst [vmem:[#allocation2 + $0x50] sm:$0xff] (!%p1743_p5), %v2560_v0  ;;  %275 = vst [vmem:[#allocation2 + $0x58] sm:$0xff] (!%p1743_p5), %v2560_v0 }
  0x74   : > { %276 = vst [vmem:[#allocation2 + $0x60] sm:$0xff] (!%p1743_p5), %v2560_v0  ;;  %277 = vst [vmem:[#allocation2 + $0x68] sm:$0xff] (!%p1743_p5), %v2560_v0 }
  0x75   : > { %278 = vst [vmem:[#allocation2 + $0x70] sm:$0xff] %v2560_v0  ;;  %279 = vst [vmem:[#allocation2 + $0x78] sm:$0xff] %v2560_v0 }
  0x76 PF: > { %v297_v1 = vld [vmem:[%s2776_s22 + $0x8] sm:$0xff]  ;;  %v299_v3 = vld [vmem:[%s2776_s22 + $0x18] sm:$0xff]  ;;  %v296_v6 = vld [vmem:[%s2776_s22] sm:$0xff]  ;;  %p1744_p11 = scmp.ne.s32.totalorder %s2544_s15, 3 }
  0x77   : > { %v301_v2 = vld [vmem:[%s2776_s22 + $0x28] sm:$0xff]  ;;  %v303_v5 = vld [vmem:[%s2776_s22 + $0x38] sm:$0xff]  ;;  %v300_v7 = vld [vmem:[%s2776_s22 + $0x20] sm:$0xff] }
  0x78   : > { %v1752_v4 = vpack.c.bf16 %v301_v2, %v297_v1  ;;  %v1880_v8 = vpack.c.bf16 %v303_v5, %v299_v3  ;;  %v1754_v9 = vpack.c.bf16 %v300_v7, %v296_v6  ;;  %v298_v10 = vld [vmem:[%s2776_s22 + $0x10] sm:$0xff]  ;;  %v305_v12 = vld [vmem:[%s2776_s22 + $0x48] sm:$0xff]  ;;  %v307_v15 = vld [vmem:[%s2776_s22 + $0x58] sm:$0xff] }
  0x79   : > { %v302_v11 = vld [vmem:[%s2776_s22 + $0x30] sm:$0xff]  ;;  %v309_v14 = vld [vmem:[%s2776_s22 + $0x68] sm:$0xff]  ;;  %v311_v16 = vld [vmem:[%s2776_s22 + $0x78] sm:$0xff] }
  0x7a   : > { %1753 = vmatprep.subr.bf16.mxu0 %v1752_v4  ;;  %v1882_v13 = vpack.c.bf16 %v302_v11, %v298_v10  ;;  %1881 = vmatprep.subr.bf16.mxu1 %v1880_v8  ;;  %v1756_v17 = vpack.c.bf16 %v309_v14, %v305_v12  ;;  %v1884_v18 = vpack.c.bf16 %v311_v16, %v307_v15  ;;  %v304_v19 = vld [vmem:[%s2776_s22 + $0x40] sm:$0xff]  ;;  %v306_v21 = vld [vmem:[%s2776_s22 + $0x50] sm:$0xff]  ;;  %v313_v24 = vld [vmem:[%s2776_s22 + $0x88] sm:$0xff] }
  0x7b   : > { %1755 = vmatpush1.bf16.msra.mxu0 %v1754_v9  ;;  %v308_v20 = vld [vmem:[%s2776_s22 + $0x60] sm:$0xff]  ;;  %v310_v23 = vld [vmem:[%s2776_s22 + $0x70] sm:$0xff]  ;;  %v317_v25 = vld [vmem:[%s2776_s22 + $0xa8] sm:$0xff] }
  0x7c   : > { %1883 = vmatpush1.bf16.msra.mxu1 %v1882_v13  ;;  %v1758_v22 = vpack.c.bf16 %v308_v20, %v304_v19  ;;  %1757 = vmatprep.subr.bf16.mxu0 %v1756_v17  ;;  %v1886_v26 = vpack.c.bf16 %v310_v23, %v306_v21  ;;  %v1760_v27 = vpack.c.bf16 %v317_v25, %v313_v24  ;;  %v315_v28 = vld [vmem:[%s2776_s22 + $0x98] sm:$0xff]  ;;  %v312_v30 = vld [vmem:[%s2776_s22 + $0x80] sm:$0xff]  ;;  %v314_v33 = vld [vmem:[%s2776_s22 + $0x90] sm:$0xff] }
  0x7d   : > { %1885 = vmatprep.subr.bf16.mxu1 %v1884_v18  ;;  %v319_v29 = vld [vmem:[%s2776_s22 + $0xb8] sm:$0xff]  ;;  %v316_v32 = vld [vmem:[%s2776_s22 + $0xa0] sm:$0xff]  ;;  %v318_v34 = vld [vmem:[%s2776_s22 + $0xb0] sm:$0xff] }
  0x7e   : > { %v1888_v31 = vpack.c.bf16 %v319_v29, %v315_v28  ;;  %v1762_v35 = vpack.c.bf16 %v316_v32, %v312_v30  ;;  %v321_v36 = vld [vmem:[%s2776_s22 + $0xc8] sm:$0xff]  ;;  %v323_v38 = vld [vmem:[%s2776_s22 + $0xd8] sm:$0xff]  ;;  %v1890_v39 = vpack.c.bf16 %v318_v34, %v314_v33  ;;  %v320_v42 = vld [vmem:[%s2776_s22 + $0xc0] sm:$0xff] }
  0x7f   : > { %1759 = vmatpush1.bf16.msra.mxu0 %v1758_v22  ;;  %v325_v37 = vld [vmem:[%s2776_s22 + $0xe8] sm:$0xff]  ;;  %v327_v41 = vld [vmem:[%s2776_s22 + $0xf8] sm:$0xff]  ;;  %v324_v43 = vld [vmem:[%s2776_s22 + $0xe0] sm:$0xff] }
  0x80   : > { %1887 = vmatpush1.bf16.msra.mxu1 %v1886_v26  ;;  %1761 = vmatprep.subr.bf16.mxu0 %v1760_v27  ;;  %v1764_v40 = vpack.c.bf16 %v325_v37, %v321_v36  ;;  %v1892_v44 = vpack.c.bf16 %v327_v41, %v323_v38  ;;  %v322_v45 = vld [vmem:[%s2776_s22 + $0xd0] sm:$0xff]  ;;  %v329_v47 = vld [vmem:[%s2776_s22 + $0x108] sm:$0xff]  ;;  %v331_v49 = vld [vmem:[%s2776_s22 + $0x118] sm:$0xff]  ;;  %v1766_v51 = vpack.c.bf16 %v324_v43, %v320_v42 }
  0x81   : > { %1889 = vmatprep.subr.bf16.mxu1 %v1888_v31  ;;  %v326_v46 = vld [vmem:[%s2776_s22 + $0xf0] sm:$0xff]  ;;  %v333_v48 = vld [vmem:[%s2776_s22 + $0x128] sm:$0xff]  ;;  %v335_v50 = vld [vmem:[%s2776_s22 + $0x138] sm:$0xff] }
  0x82   : > { %v1894_v52 = vpack.c.bf16 %v326_v46, %v322_v45  ;;  %v1768_v53 = vpack.c.bf16 %v333_v48, %v329_v47  ;;  %v328_v54 = vld [vmem:[%s2776_s22 + $0x100] sm:$0xff]  ;;  %v330_v56 = vld [vmem:[%s2776_s22 + $0x110] sm:$0xff]  ;;  %v1896_v57 = vpack.c.bf16 %v335_v50, %v331_v49  ;;  %v337_v59 = vld [vmem:[%s2776_s22 + $0x148] sm:$0xff] }
  0x83   : > { %1763 = vmatpush1.bf16.msra.mxu0 %v1762_v35  ;;  %v332_v55 = vld [vmem:[%s2776_s22 + $0x120] sm:$0xff]  ;;  %v334_v58 = vld [vmem:[%s2776_s22 + $0x130] sm:$0xff]  ;;  %v341_v60 = vld [vmem:[%s2776_s22 + $0x168] sm:$0xff] }
  0x84   : > { %1891 = vmatpush1.bf16.msra.mxu1 %v1890_v39  ;;  %1765 = vmatprep.subr.bf16.mxu0 %v1764_v40  ;;  %v339_v61 = vld [vmem:[%s2776_s22 + $0x158] sm:$0xff]  ;;  %v1770_v63 = vpack.c.bf16 %v332_v55, %v328_v54  ;;  %v1898_v0 = vpack.c.bf16 %v334_v58, %v330_v56  ;;  %v1772_v1 = vpack.c.bf16 %v341_v60, %v337_v59  ;;  %v336_v2 = vld [vmem:[%s2776_s22 + $0x140] sm:$0xff]  ;;  %v338_v4 = vld [vmem:[%s2776_s22 + $0x150] sm:$0xff] }
  0x85   : > { %1893 = vmatprep.subr.bf16.mxu1 %v1892_v44  ;;  %v343_v62 = vld [vmem:[%s2776_s22 + $0x178] sm:$0xff]  ;;  %v340_v3 = vld [vmem:[%s2776_s22 + $0x160] sm:$0xff]  ;;  %v342_v6 = vld [vmem:[%s2776_s22 + $0x170] sm:$0xff] }
  0x86   : > { %v1900_v5 = vpack.c.bf16 %v343_v62, %v339_v61  ;;  %v345_v7 = vld [vmem:[%s2776_s22 + $0x188] sm:$0xff]  ;;  %v347_v9 = vld [vmem:[%s2776_s22 + $0x198] sm:$0xff]  ;;  %v1774_v11 = vpack.c.bf16 %v340_v3, %v336_v2  ;;  %v1902_v12 = vpack.c.bf16 %v342_v6, %v338_v4  ;;  %v344_v14 = vld [vmem:[%s2776_s22 + $0x180] sm:$0xff] }
  0x87   : > { %1767 = vmatpush1.bf16.msra.mxu0 %v1766_v51  ;;  %v349_v8 = vld [vmem:[%s2776_s22 + $0x1a8] sm:$0xff]  ;;  %v351_v10 = vld [vmem:[%s2776_s22 + $0x1b8] sm:$0xff]  ;;  %v348_v15 = vld [vmem:[%s2776_s22 + $0x1a0] sm:$0xff] }
  0x88   : > { %1895 = vmatpush1.bf16.msra.mxu1 %v1894_v52  ;;  %1769 = vmatprep.subr.bf16.mxu0 %v1768_v53  ;;  %v1776_v13 = vpack.c.bf16 %v349_v8, %v345_v7  ;;  %v346_v16 = vld [vmem:[%s2776_s22 + $0x190] sm:$0xff]  ;;  %v1904_v17 = vpack.c.bf16 %v351_v10, %v347_v9  ;;  %v353_v19 = vld [vmem:[%s2776_s22 + $0x1c8] sm:$0xff]  ;;  %v355_v21 = vld [vmem:[%s2776_s22 + $0x1d8] sm:$0xff]  ;;  %v1778_v23 = vpack.c.bf16 %v348_v15, %v344_v14 }
  0x89   : > { %1897 = vmatprep.subr.bf16.mxu1 %v1896_v57  ;;  %v350_v18 = vld [vmem:[%s2776_s22 + $0x1b0] sm:$0xff]  ;;  %v357_v20 = vld [vmem:[%s2776_s22 + $0x1e8] sm:$0xff]  ;;  %v359_v22 = vld [vmem:[%s2776_s22 + $0x1f8] sm:$0xff] }
  0x8a   : > { %v1906_v24 = vpack.c.bf16 %v350_v18, %v346_v16  ;;  %v1780_v25 = vpack.c.bf16 %v357_v20, %v353_v19  ;;  %v352_v26 = vld [vmem:[%s2776_s22 + $0x1c0] sm:$0xff]  ;;  %v354_v28 = vld [vmem:[%s2776_s22 + $0x1d0] sm:$0xff]  ;;  %v1908_v29 = vpack.c.bf16 %v359_v22, %v355_v21  ;;  %v361_v31 = vld [vmem:[%s2776_s22 + $0x208] sm:$0xff] }
  0x8b   : > { %1771 = vmatpush1.bf16.msra.mxu0 %v1770_v63  ;;  %v356_v27 = vld [vmem:[%s2776_s22 + $0x1e0] sm:$0xff]  ;;  %v358_v30 = vld [vmem:[%s2776_s22 + $0x1f0] sm:$0xff]  ;;  %v365_v32 = vld [vmem:[%s2776_s22 + $0x228] sm:$0xff] }
  0x8c   : > { %1899 = vmatpush1.bf16.msra.mxu1 %v1898_v0  ;;  %1773 = vmatprep.subr.bf16.mxu0 %v1772_v1  ;;  %v363_v33 = vld [vmem:[%s2776_s22 + $0x218] sm:$0xff]  ;;  %v1782_v35 = vpack.c.bf16 %v356_v27, %v352_v26  ;;  %v1910_v36 = vpack.c.bf16 %v358_v30, %v354_v28  ;;  %v1784_v37 = vpack.c.bf16 %v365_v32, %v361_v31  ;;  %v360_v38 = vld [vmem:[%s2776_s22 + $0x200] sm:$0xff]  ;;  %v362_v40 = vld [vmem:[%s2776_s22 + $0x210] sm:$0xff] }
  0x8d   : > { %1901 = vmatprep.subr.bf16.mxu1 %v1900_v5  ;;  %v367_v34 = vld [vmem:[%s2776_s22 + $0x238] sm:$0xff]  ;;  %v364_v39 = vld [vmem:[%s2776_s22 + $0x220] sm:$0xff]  ;;  %v366_v42 = vld [vmem:[%s2776_s22 + $0x230] sm:$0xff] }
  0x8e   : > { %v1912_v41 = vpack.c.bf16 %v367_v34, %v363_v33  ;;  %v369_v43 = vld [vmem:[%s2776_s22 + $0x248] sm:$0xff]  ;;  %v371_v45 = vld [vmem:[%s2776_s22 + $0x258] sm:$0xff]  ;;  %v1786_v47 = vpack.c.bf16 %v364_v39, %v360_v38  ;;  %v1914_v48 = vpack.c.bf16 %v366_v42, %v362_v40  ;;  %v368_v50 = vld [vmem:[%s2776_s22 + $0x240] sm:$0xff] }
  0x8f   : > { %1775 = vmatpush1.bf16.msra.mxu0 %v1774_v11  ;;  %v373_v44 = vld [vmem:[%s2776_s22 + $0x268] sm:$0xff]  ;;  %v375_v46 = vld [vmem:[%s2776_s22 + $0x278] sm:$0xff]  ;;  %v372_v51 = vld [vmem:[%s2776_s22 + $0x260] sm:$0xff] }
  0x90   : > { %1903 = vmatpush1.bf16.msra.mxu1 %v1902_v12  ;;  %1777 = vmatprep.subr.bf16.mxu0 %v1776_v13  ;;  %v1788_v49 = vpack.c.bf16 %v373_v44, %v369_v43  ;;  %v370_v52 = vld [vmem:[%s2776_s22 + $0x250] sm:$0xff]  ;;  %v1916_v53 = vpack.c.bf16 %v375_v46, %v371_v45  ;;  %v377_v55 = vld [vmem:[%s2776_s22 + $0x288] sm:$0xff]  ;;  %v379_v57 = vld [vmem:[%s2776_s22 + $0x298] sm:$0xff]  ;;  %v1790_v59 = vpack.c.bf16 %v372_v51, %v368_v50 }
  0x91   : > { %1905 = vmatprep.subr.bf16.mxu1 %v1904_v17  ;;  %v374_v54 = vld [vmem:[%s2776_s22 + $0x270] sm:$0xff]  ;;  %v381_v56 = vld [vmem:[%s2776_s22 + $0x2a8] sm:$0xff]  ;;  %v383_v58 = vld [vmem:[%s2776_s22 + $0x2b8] sm:$0xff] }
  0x92   : > { %v1918_v60 = vpack.c.bf16 %v374_v54, %v370_v52  ;;  %v1792_v61 = vpack.c.bf16 %v381_v56, %v377_v55  ;;  %v376_v62 = vld [vmem:[%s2776_s22 + $0x280] sm:$0xff]  ;;  %v378_v0 = vld [vmem:[%s2776_s22 + $0x290] sm:$0xff]  ;;  %v1920_v1 = vpack.c.bf16 %v383_v58, %v379_v57  ;;  %v385_v3 = vld [vmem:[%s2776_s22 + $0x2c8] sm:$0xff] }
  0x93   : > { %1779 = vmatpush1.bf16.msra.mxu0 %v1778_v23  ;;  %v380_v63 = vld [vmem:[%s2776_s22 + $0x2a0] sm:$0xff]  ;;  %v382_v2 = vld [vmem:[%s2776_s22 + $0x2b0] sm:$0xff]  ;;  %v389_v4 = vld [vmem:[%s2776_s22 + $0x2e8] sm:$0xff] }
  0x94   : > { %1907 = vmatpush1.bf16.msra.mxu1 %v1906_v24  ;;  %1781 = vmatprep.subr.bf16.mxu0 %v1780_v25  ;;  %v387_v5 = vld [vmem:[%s2776_s22 + $0x2d8] sm:$0xff]  ;;  %v1794_v7 = vpack.c.bf16 %v380_v63, %v376_v62  ;;  %v384_v8 = vld [vmem:[%s2776_s22 + $0x2c0] sm:$0xff]  ;;  %v1922_v9 = vpack.c.bf16 %v382_v2, %v378_v0  ;;  %v1796_v10 = vpack.c.bf16 %v389_v4, %v385_v3  ;;  %v386_v12 = vld [vmem:[%s2776_s22 + $0x2d0] sm:$0xff] }
  0x95   : > { %1909 = vmatprep.subr.bf16.mxu1 %v1908_v29  ;;  %v391_v6 = vld [vmem:[%s2776_s22 + $0x2f8] sm:$0xff]  ;;  %v388_v11 = vld [vmem:[%s2776_s22 + $0x2e0] sm:$0xff]  ;;  %v390_v13 = vld [vmem:[%s2776_s22 + $0x2f0] sm:$0xff] }
  0x96   : > { %v1924_v14 = vpack.c.bf16 %v391_v6, %v387_v5  ;;  %v393_v15 = vld [vmem:[%s2776_s22 + $0x308] sm:$0xff]  ;;  %v395_v18 = vld [vmem:[%s2776_s22 + $0x318] sm:$0xff]  ;;  %v1798_v20 = vpack.c.bf16 %v388_v11, %v384_v8  ;;  %v1926_v21 = vpack.c.bf16 %v390_v13, %v386_v12  ;;  %v392_v23 = vld [vmem:[%s2776_s22 + $0x300] sm:$0xff] }
  0x97   : > { %1783 = vmatpush1.bf16.msra.mxu0 %v1782_v35  ;;  %v397_v16 = vld [vmem:[%s2776_s22 + $0x328] sm:$0xff]  ;;  %v399_v19 = vld [vmem:[%s2776_s22 + $0x338] sm:$0xff]  ;;  %v396_v24 = vld [vmem:[%s2776_s22 + $0x320] sm:$0xff] }
  0x98   : > { %1911 = vmatpush1.bf16.msra.mxu1 %v1910_v36  ;;  %1785 = vmatprep.subr.bf16.mxu0 %v1784_v37  ;;  %v281_v17 = vld [vmem:[#allocation3 + $0x8] sm:$0xff]  ;;  %v1800_v22 = vpack.c.bf16 %v397_v16, %v393_v15  ;;  %v394_v25 = vld [vmem:[%s2776_s22 + $0x310] sm:$0xff]  ;;  %v1928_v26 = vpack.c.bf16 %v399_v19, %v395_v18  ;;  %v403_v30 = vld [vmem:[%s2776_s22 + $0x358] sm:$0xff]  ;;  %v1802_v32 = vpack.c.bf16 %v396_v24, %v392_v23 }
  0x99   : > { %1913 = vmatprep.subr.bf16.mxu1 %v1912_v41  ;;  %616 = vmatprep.mubr.f32.mxu0 %v281_v17  ;;  %v398_v27 = vld [vmem:[%s2776_s22 + $0x330] sm:$0xff]  ;;  %v401_v28 = vld [vmem:[%s2776_s22 + $0x348] sm:$0xff]  ;;  %v407_v31 = vld [vmem:[%s2776_s22 + $0x378] sm:$0xff] }
  0x9a   : > { %794 = vmatprep.mubr.f32.mxu1 %v281_v17  ;;  %v405_v29 = vld [vmem:[%s2776_s22 + $0x368] sm:$0xff]  ;;  %v1930_v33 = vpack.c.bf16 %v398_v27, %v394_v25  ;;  %v400_v35 = vld [vmem:[%s2776_s22 + $0x340] sm:$0xff]  ;;  %v402_v37 = vld [vmem:[%s2776_s22 + $0x350] sm:$0xff]  ;;  %v1932_v38 = vpack.c.bf16 %v407_v31, %v403_v30 }
  0x9b   : > { %1787 = vmatpush1.bf16.msra.mxu0 %v1786_v47  ;;  %v1804_v34 = vpack.c.bf16 %v405_v29, %v401_v28  ;;  %v404_v36 = vld [vmem:[%s2776_s22 + $0x360] sm:$0xff]  ;;  %v406_v39 = vld [vmem:[%s2776_s22 + $0x370] sm:$0xff]  ;;  %v409_v40 = vld [vmem:[%s2776_s22 + $0x388] sm:$0xff] }
  0x9c   : > { %1915 = vmatpush1.bf16.msra.mxu1 %v1914_v48  ;;  %1789 = vmatprep.subr.bf16.mxu0 %v1788_v49  ;;  %v413_v41 = vld [vmem:[%s2776_s22 + $0x3a8] sm:$0xff]  ;;  %v411_v42 = vld [vmem:[%s2776_s22 + $0x398] sm:$0xff]  ;;  %v1806_v44 = vpack.c.bf16 %v404_v36, %v400_v35  ;;  %v1934_v45 = vpack.c.bf16 %v406_v39, %v402_v37  ;;  %v408_v47 = vld [vmem:[%s2776_s22 + $0x380] sm:$0xff] }
  0x9d   : > { %1917 = vmatprep.subr.bf16.mxu1 %v1916_v53  ;;  %v415_v43 = vld [vmem:[%s2776_s22 + $0x3b8] sm:$0xff]  ;;  %v1808_v46 = vpack.c.bf16 %v413_v41, %v409_v40  ;;  %v412_v48 = vld [vmem:[%s2776_s22 + $0x3a0] sm:$0xff]  ;;  %v410_v49 = vld [vmem:[%s2776_s22 + $0x390] sm:$0xff] }
  0x9e   : > { %v1936_v50 = vpack.c.bf16 %v415_v43, %v411_v42  ;;  %v414_v51 = vld [vmem:[%s2776_s22 + $0x3b0] sm:$0xff]  ;;  %v417_v52 = vld [vmem:[%s2776_s22 + $0x3c8] sm:$0xff]  ;;  %v419_v54 = vld [vmem:[%s2776_s22 + $0x3d8] sm:$0xff]  ;;  %v1810_v56 = vpack.c.bf16 %v412_v48, %v408_v47 }
  0x9f   : > { %1791 = vmatpush1.bf16.msra.mxu0 %v1790_v59  ;;  %v421_v53 = vld [vmem:[%s2776_s22 + $0x3e8] sm:$0xff]  ;;  %v423_v55 = vld [vmem:[%s2776_s22 + $0x3f8] sm:$0xff]  ;;  %v1938_v57 = vpack.c.bf16 %v414_v51, %v410_v49  ;;  %v416_v59 = vld [vmem:[%s2776_s22 + $0x3c0] sm:$0xff] }
  0xa0   : > { %1919 = vmatpush1.bf16.msra.mxu1 %v1918_v60  ;;  %1793 = vmatprep.subr.bf16.mxu0 %v1792_v61  ;;  %v1812_v58 = vpack.c.bf16 %v421_v53, %v417_v52  ;;  %v420_v60 = vld [vmem:[%s2776_s22 + $0x3e0] sm:$0xff]  ;;  %v418_v61 = vld [vmem:[%s2776_s22 + $0x3d0] sm:$0xff]  ;;  %v1940_v62 = vpack.c.bf16 %v423_v55, %v419_v54  ;;  %v425_v0 = vld [vmem:[%s2776_s22 + $0x408] sm:$0xff] }
  0xa1   : > { %1921 = vmatprep.subr.bf16.mxu1 %v1920_v1  ;;  %v422_v63 = vld [vmem:[%s2776_s22 + $0x3f0] sm:$0xff]  ;;  %v429_v1 = vld [vmem:[%s2776_s22 + $0x428] sm:$0xff]  ;;  %v427_v2 = vld [vmem:[%s2776_s22 + $0x418] sm:$0xff]  ;;  %v1814_v4 = vpack.c.bf16 %v420_v60, %v416_v59 }
  0xa2   : > { %v431_v3 = vld [vmem:[%s2776_s22 + $0x438] sm:$0xff]  ;;  %v1942_v5 = vpack.c.bf16 %v422_v63, %v418_v61  ;;  %v1816_v6 = vpack.c.bf16 %v429_v1, %v425_v0  ;;  %v428_v8 = vld [vmem:[%s2776_s22 + $0x420] sm:$0xff]  ;;  %v430_v11 = vld [vmem:[%s2776_s22 + $0x430] sm:$0xff] }
  0xa3   : > { %1795 = vmatpush1.bf16.msra.mxu0 %v1794_v7  ;;  %v424_v7 = vld [vmem:[%s2776_s22 + $0x400] sm:$0xff]  ;;  %v433_v12 = vld [vmem:[%s2776_s22 + $0x448] sm:$0xff]  ;;  %v439_v15 = vld [vmem:[%s2776_s22 + $0x478] sm:$0xff] }
  0xa4   : > { %1923 = vmatpush1.bf16.msra.mxu1 %v1922_v9  ;;  %1797 = vmatprep.subr.bf16.mxu0 %v1796_v10  ;;  %v426_v9 = vld [vmem:[%s2776_s22 + $0x410] sm:$0xff]  ;;  %v1944_v10 = vpack.c.bf16 %v431_v3, %v427_v2  ;;  %v437_v13 = vld [vmem:[%s2776_s22 + $0x468] sm:$0xff]  ;;  %v280_v16 = vld [vmem:[#allocation3] sm:$0xff]  ;;  %v1818_v17 = vpack.c.bf16 %v428_v8, %v424_v7 }
  0xa5   : > { %1925 = vmatprep.subr.bf16.mxu1 %v1924_v14  ;;  %v435_v14 = vld [vmem:[%s2776_s22 + $0x458] sm:$0xff]  ;;  %v1946_v18 = vpack.c.bf16 %v430_v11, %v426_v9  ;;  %v1820_v19 = vpack.c.bf16 %v437_v13, %v433_v12  ;;  %v438_v24 = vld [vmem:[%s2776_s22 + $0x470] sm:$0xff]  ;;  %v441_v25 = vld [vmem:[%s2776_s22 + $0x488] sm:$0xff] }
  0xa6   : > { %v1948_v23 = vpack.c.bf16 %v439_v15, %v435_v14  ;;  %v443_v27 = vld [vmem:[%s2776_s22 + $0x498] sm:$0xff]  ;;  %v446_v36 = vld [vmem:[%s2776_s22 + $0x4b0] sm:$0xff]  ;;  %v449_v37 = vld [vmem:[%s2776_s22 + $0x4c8] sm:$0xff] }
  0xa7   : > { %1799 = vmatpush1.bf16.msra.mxu0 %v1798_v20  ;;  %v432_v20 = vld [vmem:[%s2776_s22 + $0x440] sm:$0xff]  ;;  %v447_v28 = vld [vmem:[%s2776_s22 + $0x4b8] sm:$0xff]  ;;  %v454_v48 = vld [vmem:[%s2776_s22 + $0x4f0] sm:$0xff] }
  0xa8   : > { %1927 = vmatpush1.bf16.msra.mxu1 %v1926_v21  ;;  %1801 = vmatprep.subr.bf16.mxu0 %v1800_v22  ;;  %v436_v21 = vld [vmem:[%s2776_s22 + $0x460] sm:$0xff]  ;;  %v434_v22 = vld [vmem:[%s2776_s22 + $0x450] sm:$0xff]  ;;  %v1952_v35 = vpack.c.bf16 %v447_v28, %v443_v27  ;;  %v451_v39 = vld [vmem:[%s2776_s22 + $0x4d8] sm:$0xff] }
  0xa9   : > { %1929 = vmatprep.subr.bf16.mxu1 %v1928_v26  ;;  %v445_v26 = vld [vmem:[%s2776_s22 + $0x4a8] sm:$0xff]  ;;  %v1822_v29 = vpack.c.bf16 %v436_v21, %v432_v20  ;;  %v1950_v30 = vpack.c.bf16 %v438_v24, %v434_v22  ;;  %v455_v40 = vld [vmem:[%s2776_s22 + $0x4f8] sm:$0xff]  ;;  %v456_v54 = vld [vmem:[%s2776_s22 + $0x500] sm:$0xff] }
  0xaa   : > { %v1824_v31 = vpack.c.bf16 %v445_v26, %v441_v25  ;;  %v1956_v47 = vpack.c.bf16 %v455_v40, %v451_v39  ;;  %v457_v49 = vld [vmem:[%s2776_s22 + $0x508] sm:$0xff]  ;;  %v459_v51 = vld [vmem:[%s2776_s22 + $0x518] sm:$0xff]  ;;  %v460_v55 = vld [vmem:[%s2776_s22 + $0x520] sm:$0xff] }
  0xab   : > { %1803 = vmatpush1.bf16.msra.mxu0 %v1802_v32  ;;  %v440_v32 = vld [vmem:[%s2776_s22 + $0x480] sm:$0xff]  ;;  %v463_v52 = vld [vmem:[%s2776_s22 + $0x538] sm:$0xff]  ;;  %v462_v59 = vld [vmem:[%s2776_s22 + $0x530] sm:$0xff]  ;;  %v1834_v3 = vpack.c.bf16 %v460_v55, %v456_v54 }
  0xac   : > { %1931 = vmatpush1.bf16.msra.mxu1 %v1930_v33  ;;  %1805 = vmatprep.subr.bf16.mxu0 %v1804_v34  ;;  %v444_v33 = vld [vmem:[%s2776_s22 + $0x4a0] sm:$0xff]  ;;  %v442_v34 = vld [vmem:[%s2776_s22 + $0x490] sm:$0xff]  ;;  %v465_v60 = vld [vmem:[%s2776_s22 + $0x548] sm:$0xff]  ;;  %v1960_v61 = vpack.c.bf16 %v463_v52, %v459_v51 }
  0xad   : > { %1933 = vmatprep.subr.bf16.mxu1 %v1932_v38  ;;  %v453_v38 = vld [vmem:[%s2776_s22 + $0x4e8] sm:$0xff]  ;;  %v1826_v41 = vpack.c.bf16 %v444_v33, %v440_v32  ;;  %v1954_v42 = vpack.c.bf16 %v446_v36, %v442_v34  ;;  %v284_v0 = vld [vmem:[#allocation3 + $0x20] sm:$0xff]  ;;  %v467_v1 = vld [vmem:[%s2776_s22 + $0x558] sm:$0xff] }
  0xae   : > { %v1828_v43 = vpack.c.bf16 %v453_v38, %v449_v37  ;;  %v285_v63 = vld [vmem:[#allocation3 + $0x28] sm:$0xff]  ;;  %v471_v2 = vld [vmem:[%s2776_s22 + $0x578] sm:$0xff]  ;;  %v466_v8 = vld [vmem:[%s2776_s22 + $0x550] sm:$0xff] }
  0xaf   : > { %1807 = vmatpush1.bf16.msra.mxu0 %v1806_v44  ;;  %v448_v44 = vld [vmem:[%s2776_s22 + $0x4c0] sm:$0xff]  ;;  %v289_v9 = vld [vmem:[#allocation3 + $0x48] sm:$0xff]  ;;  %v1964_v11 = vpack.c.bf16 %v471_v2, %v467_v1  ;;  %v470_v12 = vld [vmem:[%s2776_s22 + $0x570] sm:$0xff] }
  0xb0   : > { %1935 = vmatpush1.bf16.msra.mxu1 %v1934_v45  ;;  %1809 = vmatprep.subr.bf16.mxu0 %v1808_v46  ;;  %v452_v45 = vld [vmem:[%s2776_s22 + $0x4e0] sm:$0xff]  ;;  %v450_v46 = vld [vmem:[%s2776_s22 + $0x4d0] sm:$0xff]  ;;  %v473_v13 = vld [vmem:[%s2776_s22 + $0x588] sm:$0xff]  ;;  %v1966_v20 = vpack.c.bf16 %v470_v12, %v466_v8 }
  0xb1   : > { %1937 = vmatprep.subr.bf16.mxu1 %v1936_v50  ;;  %v461_v50 = vld [vmem:[%s2776_s22 + $0x528] sm:$0xff]  ;;  %v1830_v53 = vpack.c.bf16 %v452_v45, %v448_v44  ;;  %v475_v15 = vld [vmem:[%s2776_s22 + $0x598] sm:$0xff]  ;;  %v476_v22 = vld [vmem:[%s2776_s22 + $0x5a0] sm:$0xff] }
  0xb2   : > { %v477_v14 = vld [vmem:[%s2776_s22 + $0x5a8] sm:$0xff]  ;;  %v292_v24 = vld [vmem:[#allocation3 + $0x60] sm:$0xff]  ;;  %v478_v26 = vld [vmem:[%s2776_s22 + $0x5b0] sm:$0xff] }
  0xb3   : > { %1811 = vmatpush1.bf16.msra.mxu0 %v1810_v56  ;;  %v1958_v56 = vpack.c.bf16 %v454_v48, %v450_v46  ;;  %v1840_v21 = vpack.c.bf16 %v477_v14, %v473_v13  ;;  %v481_v27 = vld [vmem:[%s2776_s22 + $0x5c8] sm:$0xff]  ;;  %v283_v32 = vld [vmem:[#allocation3 + $0x18] sm:$0xff]  ;;  %v484_v36 = vld [vmem:[%s2776_s22 + $0x5e0] sm:$0xff] }
  0xb4   : > { %1939 = vmatpush1.bf16.msra.mxu1 %v1938_v57  ;;  %1813 = vmatprep.subr.bf16.mxu0 %v1812_v58  ;;  %v1832_v57 = vpack.c.bf16 %v461_v50, %v457_v49  ;;  %v458_v58 = vld [vmem:[%s2776_s22 + $0x510] sm:$0xff]  ;;  %v485_v28 = vld [vmem:[%s2776_s22 + $0x5e8] sm:$0xff]  ;;  %v492_v48 = vld [vmem:[%s2776_s22 + $0x620] sm:$0xff] }
  0xb5   : > { %1941 = vmatprep.subr.bf16.mxu1 %v1940_v62  ;;  %v469_v62 = vld [vmem:[%s2776_s22 + $0x568] sm:$0xff]  ;;  %v1844_v34 = vpack.c.bf16 %v485_v28, %v481_v27  ;;  %v482_v37 = vld [vmem:[%s2776_s22 + $0x5d0] sm:$0xff]  ;;  %v499_v54 = vld [vmem:[%s2776_s22 + $0x658] sm:$0xff] }
  0xb6   : > { %v1836_v7 = vpack.c.bf16 %v469_v62, %v465_v60  ;;  %v486_v39 = vld [vmem:[%s2776_s22 + $0x5f0] sm:$0xff]  ;;  %v489_v40 = vld [vmem:[%s2776_s22 + $0x608] sm:$0xff]  ;;  %v503_v55 = vld [vmem:[%s2776_s22 + $0x678] sm:$0xff] }
  0xb7   : > { %1815 = vmatpush1.bf16.msra.mxu0 %v1814_v4  ;;  %v464_v4 = vld [vmem:[%s2776_s22 + $0x540] sm:$0xff]  ;;  %v1974_v45 = vpack.c.bf16 %v486_v39, %v482_v37  ;;  %v490_v49 = vld [vmem:[%s2776_s22 + $0x610] sm:$0xff]  ;;  %v497_v52 = vld [vmem:[%s2776_s22 + $0x648] sm:$0xff]  ;;  %v1980_v62 = vpack.c.bf16 %v503_v55, %v499_v54 }
  0xb8   : > { %1943 = vmatpush1.bf16.msra.mxu1 %v1942_v5  ;;  %1817 = vmatprep.subr.bf16.mxu0 %v1816_v6  ;;  %v468_v5 = vld [vmem:[%s2776_s22 + $0x560] sm:$0xff]  ;;  %v1962_v6 = vpack.c.bf16 %v462_v59, %v458_v58  ;;  %v494_v51 = vld [vmem:[%s2776_s22 + $0x630] sm:$0xff]  ;;  %v509_v1 = vld [vmem:[%s2776_s22 + $0x6a8] sm:$0xff] }
  0xb9   : > { %1945 = vmatprep.subr.bf16.mxu1 %v1944_v10  ;;  %v288_v10 = vld [vmem:[#allocation3 + $0x40] sm:$0xff]  ;;  %v507_v2 = vld [vmem:[%s2776_s22 + $0x698] sm:$0xff]  ;;  %v513_v12 = vld [vmem:[%s2776_s22 + $0x6c8] sm:$0xff] }
  0xba   : > { %617 = vmatmul.mubr.f32.vlgmr.msra.gmra.mrb[0].mxu0 %v280_v16  ;;  %v496_v59 = vld [vmem:[%s2776_s22 + $0x640] sm:$0xff]  ;;  %v517_v13 = vld [vmem:[%s2776_s22 + $0x6e8] sm:$0xff]  ;;  %v515_v14 = vld [vmem:[%s2776_s22 + $0x6d8] sm:$0xff] }
  0xbb   : > { %1819 = vmatpush1.bf16.msra.mxu0 %v1818_v17  ;;  %795 = vmatmul.mubr.f32.vlgmr.msra.gmra.mrb[0].mxu1 %v280_v16  ;;  %v479_v16 = vld [vmem:[%s2776_s22 + $0x5b8] sm:$0xff]  ;;  %v1838_v17 = vpack.c.bf16 %v468_v5, %v464_v4  ;;  %v500_v60 = vld [vmem:[%s2776_s22 + $0x660] sm:$0xff]  ;;  %v533_v37 = vld [vmem:[%s2776_s22 + $0x768] sm:$0xff] }
  0xbc   : > { %1947 = vmatpush1.bf16.msra.mxu1 %v1946_v18  ;;  %1821 = vmatprep.subr.bf16.mxu0 %v1820_v19  ;;  %v472_v18 = vld [vmem:[%s2776_s22 + $0x580] sm:$0xff]  ;;  %v293_v19 = vld [vmem:[#allocation3 + $0x68] sm:$0xff]  ;;  %v1968_v25 = vpack.c.bf16 %v479_v16, %v475_v15  ;;  %v1854_v4 = vpack.c.bf16 %v500_v60, %v496_v59  ;;  %v519_v15 = vld [vmem:[%s2776_s22 + $0x6f8] sm:$0xff] }
  0xbd   : > { %1949 = vmatprep.subr.bf16.mxu1 %v1948_v23  ;;  %622 = vmatprep.mubr.f32.mxu0 %v285_v63  ;;  %v474_v23 = vld [vmem:[%s2776_s22 + $0x590] sm:$0xff]  ;;  %v508_v8 = vld [vmem:[%s2776_s22 + $0x6a0] sm:$0xff]  ;;  %v527_v27 = vld [vmem:[%s2776_s22 + $0x738] sm:$0xff] }
  0xbe   : > { %800 = vmatprep.mubr.f32.mxu1 %v285_v63  ;;  %623 = vmatmul.mubr.f32.gmra.mrb[2].mxu0 %v284_v0  ;;  %v1970_v33 = vpack.c.bf16 %v478_v26, %v474_v23  ;;  %v502_v63 = vld [vmem:[%s2776_s22 + $0x670] sm:$0xff]  ;;  %v523_v26 = vld [vmem:[%s2776_s22 + $0x718] sm:$0xff]  ;;  %v536_v55 = vld [vmem:[%s2776_s22 + $0x780] sm:$0xff] }
  0xbf   : > { %1823 = vmatpush1.bf16.msra.mxu0 %v1822_v29  ;;  %801 = vmatmul.mubr.f32.gmra.mrb[2].mxu1 %v284_v0  ;;  %v483_v29 = vld [vmem:[%s2776_s22 + $0x5d8] sm:$0xff]  ;;  %v505_v0 = vld [vmem:[%s2776_s22 + $0x688] sm:$0xff]  ;;  %v518_v23 = vld [vmem:[%s2776_s22 + $0x6f0] sm:$0xff] }
  0xc0   : > { %1951 = vmatpush1.bf16.msra.mxu1 %v1950_v30  ;;  %1825 = vmatprep.subr.bf16.mxu0 %v1824_v31  ;;  %v487_v30 = vld [vmem:[%s2776_s22 + $0x5f8] sm:$0xff]  ;;  %v1842_v31 = vpack.c.bf16 %v476_v22, %v472_v18  ;;  %v1860_v18 = vpack.c.bf16 %v517_v13, %v513_v12  ;;  %v1988_v22 = vpack.c.bf16 %v519_v15, %v515_v14  ;;  %v542_v59 = vld [vmem:[%s2776_s22 + $0x7b0] sm:$0xff]  ;;  %v545_v60 = vld [vmem:[%s2776_s22 + $0x7c8] sm:$0xff] }
  0xc1   : > { %1953 = vmatprep.subr.bf16.mxu1 %v1952_v35  ;;  %628 = vmatprep.mubr.f32.mxu0 %v289_v9  ;;  %v480_v35 = vld [vmem:[%s2776_s22 + $0x5c0] sm:$0xff]  ;;  %v1972_v38 = vpack.c.bf16 %v487_v30, %v483_v29  ;;  %v535_v39 = vld [vmem:[%s2776_s22 + $0x778] sm:$0xff] }
  0xc2   : > { %806 = vmatprep.mubr.f32.mxu1 %v289_v9  ;;  %629 = vmatmul.mubr.f32.gmra.mrb[4].mxu0 %v288_v10  ;;  %v1846_v44 = vpack.c.bf16 %v484_v36, %v480_v35  ;;  %v506_v9 = vld [vmem:[%s2776_s22 + $0x690] sm:$0xff]  ;;  %v529_v36 = vld [vmem:[%s2776_s22 + $0x748] sm:$0xff] }
  0xc3   : > { %1827 = vmatpush1.bf16.msra.mxu0 %v1826_v41  ;;  %807 = vmatmul.mubr.f32.gmra.mrb[4].mxu1 %v288_v10  ;;  %v493_v41 = vld [vmem:[%s2776_s22 + $0x628] sm:$0xff]  ;;  %v526_v35 = vld [vmem:[%s2776_s22 + $0x730] sm:$0xff] }
  0xc4   : > { %1955 = vmatpush1.bf16.msra.mxu1 %v1954_v42  ;;  %1829 = vmatprep.subr.bf16.mxu0 %v1828_v43  ;;  %v491_v42 = vld [vmem:[%s2776_s22 + $0x618] sm:$0xff]  ;;  %v1848_v46 = vpack.c.bf16 %v493_v41, %v489_v40 }
  0xc5   : > { %1957 = vmatprep.subr.bf16.mxu1 %v1956_v47  ;;  %634 = vmatprep.mubr.f32.mxu0 %v293_v19  ;;  %v495_v43 = vld [vmem:[%s2776_s22 + $0x638] sm:$0xff]  ;;  %v488_v47 = vld [vmem:[%s2776_s22 + $0x600] sm:$0xff] }
  0xc6   : > { %812 = vmatprep.mubr.f32.mxu1 %v293_v19  ;;  %635 = vmatmul.mubr.f32.gmra.mrb[6].mxu0 %v292_v24  ;;  %v1976_v50 = vpack.c.bf16 %v495_v43, %v491_v42  ;;  %v512_v19 = vld [vmem:[%s2776_s22 + $0x6c0] sm:$0xff]  ;;  %v1868_v42 = vpack.c.bf16 %v533_v37, %v529_v36  ;;  %v286_v36 = vld [vmem:[#allocation3 + $0x30] sm:$0xff]  ;;  %v959_v37 = vld [vmem:[%s2782_s27 + $0x98] sm:$0xff] }
  0xc7   : > { %1831 = vmatpush1.bf16.msra.mxu0 %v1830_v53  ;;  %813 = vmatmul.mubr.f32.gmra.mrb[6].mxu1 %v292_v24  ;;  %v501_v53 = vld [vmem:[%s2776_s22 + $0x668] sm:$0xff]  ;;  %v528_v43 = vld [vmem:[%s2776_s22 + $0x740] sm:$0xff] }
  0xc8   : > { %1959 = vmatpush1.bf16.msra.mxu1 %v1958_v56  ;;  %1833 = vmatprep.subr.bf16.mxu0 %v1832_v57  ;;  %v1850_v56 = vpack.c.bf16 %v492_v48, %v488_v47  ;;  %v1978_v57 = vpack.c.bf16 %v494_v51, %v490_v49  ;;  %v1852_v58 = vpack.c.bf16 %v501_v53, %v497_v52  ;;  %v521_v24 = vld [vmem:[%s2776_s22 + $0x708] sm:$0xff]  ;;  %v534_v47 = vld [vmem:[%s2776_s22 + $0x770] sm:$0xff]  ;;  %v543_v51 = vld [vmem:[%s2776_s22 + $0x7b8] sm:$0xff] }
  0xc9   : > { %1961 = vmatprep.subr.bf16.mxu1 %v1960_v61  ;;  %705 = vmatprep.mubr.f32.mxu0 %v283_v32  ;;  %v498_v61 = vld [vmem:[%s2776_s22 + $0x650] sm:$0xff]  ;;  %v537_v48 = vld [vmem:[%s2776_s22 + $0x788] sm:$0xff] }
  0xca   : > { %883 = vmatprep.mubr.f32.mxu1 %v283_v32  ;;  %v1982_v5 = vpack.c.bf16 %v502_v63, %v498_v61  ;;  %v524_v32 = vld [vmem:[%s2776_s22 + $0x720] sm:$0xff]  ;;  %v541_v49 = vld [vmem:[%s2776_s22 + $0x7a8] sm:$0xff]  ;;  %v551_v63 = vld [vmem:[%s2776_s22 + $0x7f8] sm:$0xff] }
  0xcb   : > { %1835 = vmatpush1.bf16.msra.mxu0 %v1834_v3  ;;  %v511_v3 = vld [vmem:[%s2776_s22 + $0x6b8] sm:$0xff]  ;;  %v1872_v54 = vpack.c.bf16 %v541_v49, %v537_v48  ;;  %v549_v61 = vld [vmem:[%s2776_s22 + $0x7e8] sm:$0xff] }
  0xcc   : > { %1963 = vmatpush1.bf16.msra.mxu1 %v1962_v6  ;;  %1837 = vmatprep.subr.bf16.mxu0 %v1836_v7  ;;  %v1856_v6 = vpack.c.bf16 %v509_v1, %v505_v0  ;;  %v504_v7 = vld [vmem:[%s2776_s22 + $0x680] sm:$0xff]  ;;  %v1984_v10 = vpack.c.bf16 %v511_v3, %v507_v2  ;;  %v1876_v2 = vpack.c.bf16 %v549_v61, %v545_v60  ;;  %v965_v48 = vld [vmem:[%s2782_s27 + $0xc8] sm:$0xff]  ;;  %v970_v61 = vld [vmem:[%s2782_s27 + $0xf0] sm:$0xff] }
  0xcd   : > { %1965 = vmatprep.subr.bf16.mxu1 %v1964_v11  ;;  %v510_v11 = vld [vmem:[%s2776_s22 + $0x6b0] sm:$0xff]  ;;  %v1858_v16 = vpack.c.bf16 %v508_v8, %v504_v7  ;;  %v544_v3 = vld [vmem:[%s2776_s22 + $0x7c0] sm:$0xff]  ;;  %v941_v8 = vld [vmem:[%s2782_s27 + $0x8] sm:$0xff] }
  0xce   : > { %v550_v7 = vld [vmem:[%s2776_s22 + $0x7f0] sm:$0xff]  ;;  %v969_v49 = vld [vmem:[%s2782_s27 + $0xe8] sm:$0xff] }
  0xcf   : > { %1839 = vmatpush1.bf16.msra.mxu0 %v1838_v17  ;;  %v1986_v17 = vpack.c.bf16 %v510_v11, %v506_v9  ;;  %v945_v9 = vld [vmem:[%s2782_s27 + $0x28] sm:$0xff]  ;;  %v947_v11 = vld [vmem:[%s2782_s27 + $0x38] sm:$0xff] }
  0xd0   : > { %1967 = vmatpush1.bf16.msra.mxu1 %v1966_v20  ;;  %1841 = vmatprep.subr.bf16.mxu0 %v1840_v21  ;;  %v516_v20 = vld [vmem:[%s2776_s22 + $0x6e0] sm:$0xff]  ;;  %v514_v21 = vld [vmem:[%s2776_s22 + $0x6d0] sm:$0xff]  ;;  %v2008_v14 = vpack.c.bf16 %v945_v9, %v941_v8 }
  0xd1   : > { %1969 = vmatprep.subr.bf16.mxu1 %v1968_v25  ;;  %v525_v25 = vld [vmem:[%s2776_s22 + $0x728] sm:$0xff]  ;;  %v1862_v28 = vpack.c.bf16 %v516_v20, %v512_v19  ;;  %v1990_v29 = vpack.c.bf16 %v518_v23, %v514_v21  ;;  %v946_v19 = vld [vmem:[%s2782_s27 + $0x30] sm:$0xff]  ;;  %v951_v23 = vld [vmem:[%s2782_s27 + $0x58] sm:$0xff] }
  0xd2   : > { %v1864_v30 = vpack.c.bf16 %v525_v25, %v521_v24  ;;  %v949_v20 = vld [vmem:[%s2782_s27 + $0x48] sm:$0xff]  ;;  %v955_v24 = vld [vmem:[%s2782_s27 + $0x78] sm:$0xff]  ;;  %v974_v8 = vld [vmem:[%s2782_s27 + $0x110] sm:$0xff] }
  0xd3   : > { %1843 = vmatpush1.bf16.msra.mxu0 %v1842_v31  ;;  %v520_v31 = vld [vmem:[%s2776_s22 + $0x700] sm:$0xff]  ;;  %v953_v21 = vld [vmem:[%s2782_s27 + $0x68] sm:$0xff]  ;;  %v287_v25 = vld [vmem:[#allocation3 + $0x38] sm:$0xff] }
  0xd4   : > { %1971 = vmatpush1.bf16.msra.mxu1 %v1970_v33  ;;  %1845 = vmatprep.subr.bf16.mxu0 %v1844_v34  ;;  %v522_v33 = vld [vmem:[%s2776_s22 + $0x710] sm:$0xff]  ;;  %v1992_v34 = vpack.c.bf16 %v527_v27, %v523_v26  ;;  %v1866_v40 = vpack.c.bf16 %v524_v32, %v520_v31  ;;  %v2140_v32 = vpack.c.bf16 %v955_v24, %v951_v23  ;;  %v989_v23 = vld [vmem:[%s2782_s27 + $0x188] sm:$0xff] }
  0xd5   : > { %1973 = vmatprep.subr.bf16.mxu1 %v1972_v38  ;;  %v531_v38 = vld [vmem:[%s2776_s22 + $0x758] sm:$0xff]  ;;  %v1994_v41 = vpack.c.bf16 %v526_v35, %v522_v33  ;;  %v950_v31 = vld [vmem:[%s2782_s27 + $0x50] sm:$0xff]  ;;  %v961_v35 = vld [vmem:[%s2782_s27 + $0xa8] sm:$0xff] }
  0xd6   : > { %v954_v33 = vld [vmem:[%s2782_s27 + $0x70] sm:$0xff]  ;;  %v993_v24 = vld [vmem:[%s2782_s27 + $0x1a8] sm:$0xff] }
  0xd7   : > { %1847 = vmatpush1.bf16.msra.mxu0 %v1846_v44  ;;  %v532_v44 = vld [vmem:[%s2776_s22 + $0x760] sm:$0xff] }
  0xd8   : > { %1975 = vmatpush1.bf16.msra.mxu1 %v1974_v45  ;;  %1849 = vmatprep.subr.bf16.mxu0 %v1848_v46  ;;  %v530_v45 = vld [vmem:[%s2776_s22 + $0x750] sm:$0xff]  ;;  %v1996_v46 = vpack.c.bf16 %v535_v39, %v531_v38  ;;  %v1870_v52 = vpack.c.bf16 %v532_v44, %v528_v43  ;;  %v963_v38 = vld [vmem:[%s2782_s27 + $0xb8] sm:$0xff]  ;;  %v956_v43 = vld [vmem:[%s2782_s27 + $0x80] sm:$0xff] }
  0xd9   : > { %1977 = vmatprep.subr.bf16.mxu1 %v1976_v50  ;;  %v539_v50 = vld [vmem:[%s2776_s22 + $0x798] sm:$0xff]  ;;  %v1998_v53 = vpack.c.bf16 %v534_v47, %v530_v45  ;;  %v960_v44 = vld [vmem:[%s2782_s27 + $0xa0] sm:$0xff]  ;;  %v958_v45 = vld [vmem:[%s2782_s27 + $0x90] sm:$0xff] }
  0xda   : > { %v291_v39 = vld [vmem:[#allocation3 + $0x58] sm:$0xff]  ;;  %v962_v47 = vld [vmem:[%s2782_s27 + $0xb0] sm:$0xff] }
  0xdb   : > { %1851 = vmatpush1.bf16.msra.mxu0 %v1850_v56  ;;  %v540_v56 = vld [vmem:[%s2776_s22 + $0x7a0] sm:$0xff] }
  0xdc   : > { %1979 = vmatpush1.bf16.msra.mxu1 %v1978_v57  ;;  %1853 = vmatprep.subr.bf16.mxu0 %v1852_v58  ;;  %v538_v57 = vld [vmem:[%s2776_s22 + $0x790] sm:$0xff]  ;;  %v2000_v58 = vpack.c.bf16 %v543_v51, %v539_v50  ;;  %v1874_v0 = vpack.c.bf16 %v540_v56, %v536_v55  ;;  %v967_v51 = vld [vmem:[%s2782_s27 + $0xd8] sm:$0xff]  ;;  %v2146_v55 = vpack.c.bf16 %v962_v47, %v958_v45  ;;  %v1005_v47 = vld [vmem:[%s2782_s27 + $0x208] sm:$0xff] }
  0xdd   : > { %1981 = vmatprep.subr.bf16.mxu1 %v1980_v62  ;;  %v547_v62 = vld [vmem:[%s2776_s22 + $0x7d8] sm:$0xff]  ;;  %v2002_v1 = vpack.c.bf16 %v542_v59, %v538_v57  ;;  %v290_v50 = vld [vmem:[#allocation3 + $0x50] sm:$0xff]  ;;  %v2020_v56 = vpack.c.bf16 %v969_v49, %v965_v48  ;;  %v964_v57 = vld [vmem:[%s2782_s27 + $0xc0] sm:$0xff] }
  0xde   : > { %v966_v59 = vld [vmem:[%s2782_s27 + $0xd0] sm:$0xff]  ;;  %v1009_v48 = vld [vmem:[%s2782_s27 + $0x228] sm:$0xff]  ;;  %v1007_v49 = vld [vmem:[%s2782_s27 + $0x218] sm:$0xff] }
  0xdf   : > { %1855 = vmatpush1.bf16.msra.mxu0 %v1854_v4  ;;  %v548_v4 = vld [vmem:[%s2776_s22 + $0x7e0] sm:$0xff] }
  0xe0   : > { %1983 = vmatpush1.bf16.msra.mxu1 %v1982_v5  ;;  %1857 = vmatprep.subr.bf16.mxu0 %v1856_v6  ;;  %v546_v5 = vld [vmem:[%s2776_s22 + $0x7d0] sm:$0xff]  ;;  %v2004_v6 = vpack.c.bf16 %v551_v63, %v547_v62  ;;  %v1878_v12 = vpack.c.bf16 %v548_v4, %v544_v3  ;;  %v973_v62 = vld [vmem:[%s2782_s27 + $0x108] sm:$0xff]  ;;  %v2150_v4 = vpack.c.bf16 %v970_v61, %v966_v59  ;;  %v1015_v61 = vld [vmem:[%s2782_s27 + $0x258] sm:$0xff] }
  0xe1   : > { %1985 = vmatprep.subr.bf16.mxu1 %v1984_v10  ;;  %v943_v10 = vld [vmem:[%s2782_s27 + $0x18] sm:$0xff]  ;;  %v2006_v13 = vpack.c.bf16 %v550_v7, %v546_v5  ;;  %v977_v63 = vld [vmem:[%s2782_s27 + $0x128] sm:$0xff]  ;;  %v976_v7 = vld [vmem:[%s2782_s27 + $0x120] sm:$0xff] }
  0xe2   : > { %v2136_v15 = vpack.c.bf16 %v947_v11, %v943_v10  ;;  %v2024_v5 = vpack.c.bf16 %v977_v63, %v973_v62  ;;  %v978_v10 = vld [vmem:[%s2782_s27 + $0x130] sm:$0xff]  ;;  %v981_v11 = vld [vmem:[%s2782_s27 + $0x148] sm:$0xff]  ;;  %v1019_v62 = vld [vmem:[%s2782_s27 + $0x278] sm:$0xff] }
  0xe3   : > { %1859 = vmatpush1.bf16.msra.mxu0 %v1858_v16  ;;  %v940_v16 = vld [vmem:[%s2782_s27] sm:$0xff]  ;;  %v1013_v59 = vld [vmem:[%s2782_s27 + $0x248] sm:$0xff] }
  0xe4   : > { %1987 = vmatpush1.bf16.msra.mxu1 %v1986_v17  ;;  %1861 = vmatprep.subr.bf16.mxu0 %v1860_v18  ;;  %v944_v17 = vld [vmem:[%s2782_s27 + $0x20] sm:$0xff]  ;;  %v942_v18 = vld [vmem:[%s2782_s27 + $0x10] sm:$0xff] }
  0xe5   : > { %1989 = vmatprep.subr.bf16.mxu1 %v1988_v22  ;;  %v282_v22 = vld [vmem:[#allocation3 + $0x10] sm:$0xff]  ;;  %v2010_v26 = vpack.c.bf16 %v944_v17, %v940_v16  ;;  %v2138_v27 = vpack.c.bf16 %v946_v19, %v942_v18  ;;  %v2154_v16 = vpack.c.bf16 %v978_v10, %v974_v8  ;;  %v980_v18 = vld [vmem:[%s2782_s27 + $0x140] sm:$0xff]  ;;  %v1025_v8 = vld [vmem:[%s2782_s27 + $0x2a8] sm:$0xff] }
  0xe6   : > { %v984_v19 = vld [vmem:[%s2782_s27 + $0x160] sm:$0xff]  ;;  %v1027_v10 = vld [vmem:[%s2782_s27 + $0x2b8] sm:$0xff] }
  0xe7   : > { %1863 = vmatpush1.bf16.msra.mxu0 %v1862_v28  ;;  %v2012_v28 = vpack.c.bf16 %v953_v21, %v949_v20  ;;  %v982_v20 = vld [vmem:[%s2782_s27 + $0x150] sm:$0xff] }
  0xe8   : > { %1991 = vmatpush1.bf16.msra.mxu1 %v1990_v29  ;;  %1865 = vmatprep.subr.bf16.mxu0 %v1864_v30  ;;  %v948_v29 = vld [vmem:[%s2782_s27 + $0x40] sm:$0xff] }
  0xe9   : > { %1993 = vmatprep.subr.bf16.mxu1 %v1992_v34  ;;  %v952_v30 = vld [vmem:[%s2782_s27 + $0x60] sm:$0xff]  ;;  %v957_v34 = vld [vmem:[%s2782_s27 + $0x88] sm:$0xff] }
  0xeb   : > { %1867 = vmatpush1.bf16.msra.mxu0 %v1866_v40  ;;  %v2014_v40 = vpack.c.bf16 %v952_v30, %v948_v29  ;;  %v2032_v29 = vpack.c.bf16 %v993_v24, %v989_v23  ;;  %v988_v30 = vld [vmem:[%s2782_s27 + $0x180] sm:$0xff] }
  0xec   : > { %1995 = vmatpush1.bf16.msra.mxu1 %v1994_v41  ;;  %1869 = vmatprep.subr.bf16.mxu0 %v1868_v42  ;;  %v2142_v41 = vpack.c.bf16 %v954_v33, %v950_v31  ;;  %v2016_v42 = vpack.c.bf16 %v961_v35, %v957_v34  ;;  %v992_v31 = vld [vmem:[%s2782_s27 + $0x1a0] sm:$0xff]  ;;  %v994_v34 = vld [vmem:[%s2782_s27 + $0x1b0] sm:$0xff]  ;;  %v997_v35 = vld [vmem:[%s2782_s27 + $0x1c8] sm:$0xff] }
  0xed   : > { %1997 = vmatprep.subr.bf16.mxu1 %v1996_v46  ;;  %v2144_v46 = vpack.c.bf16 %v963_v38, %v959_v37  ;;  %v999_v37 = vld [vmem:[%s2782_s27 + $0x1d8] sm:$0xff] }
  0xee   : > { %v1003_v38 = vld [vmem:[%s2782_s27 + $0x1f8] sm:$0xff] }
  0xef   : > { %1871 = vmatpush1.bf16.msra.mxu0 %v1870_v52  ;;  %v971_v52 = vld [vmem:[%s2782_s27 + $0xf8] sm:$0xff]  ;;  %v2164_v45 = vpack.c.bf16 %v1003_v38, %v999_v37  ;;  %v1036_v38 = vld [vmem:[%s2782_s27 + $0x300] sm:$0xff] }
  0xf0   : > { %1999 = vmatpush1.bf16.msra.mxu1 %v1998_v53  ;;  %1873 = vmatprep.subr.bf16.mxu0 %v1872_v54  ;;  %v295_v53 = vld [vmem:[#allocation3 + $0x78] sm:$0xff]  ;;  %v2018_v54 = vpack.c.bf16 %v960_v44, %v956_v43  ;;  %v2148_v60 = vpack.c.bf16 %v971_v52, %v967_v51  ;;  %v1000_v43 = vld [vmem:[%s2782_s27 + $0x1e0] sm:$0xff]  ;;  %v998_v44 = vld [vmem:[%s2782_s27 + $0x1d0] sm:$0xff] }
  0xf1   : > { %2001 = vmatprep.subr.bf16.mxu1 %v2000_v58  ;;  %v968_v58 = vld [vmem:[%s2782_s27 + $0xe0] sm:$0xff] }
  0xf2   : > { %v2022_v3 = vpack.c.bf16 %v968_v58, %v964_v57  ;;  %v1010_v58 = vld [vmem:[%s2782_s27 + $0x230] sm:$0xff] }
  0xf3   : > { %1875 = vmatpush1.bf16.msra.mxu0 %v1874_v0  ;;  %v294_v0 = vld [vmem:[#allocation3 + $0x70] sm:$0xff] }
  0xf4   : > { %2003 = vmatpush1.bf16.msra.mxu1 %v2002_v1  ;;  %1877 = vmatprep.subr.bf16.mxu0 %v1876_v2  ;;  %v975_v1 = vld [vmem:[%s2782_s27 + $0x118] sm:$0xff] }
  0xf5   : > { %2005 = vmatprep.subr.bf16.mxu1 %v2004_v6  ;;  %v979_v2 = vld [vmem:[%s2782_s27 + $0x138] sm:$0xff]  ;;  %v972_v6 = vld [vmem:[%s2782_s27 + $0x100] sm:$0xff] }
  0xf6   : > { %v2152_v9 = vpack.c.bf16 %v979_v2, %v975_v1  ;;  %v1012_v2 = vld [vmem:[%s2782_s27 + $0x240] sm:$0xff] }
  0xf7   : > { %1879 = vmatpush1.bf16.msra.mxu0 %v1878_v12  ;;  %v985_v12 = vld [vmem:[%s2782_s27 + $0x168] sm:$0xff] }
  0xf8   : > { %2007 = vmatpush1.bf16.msra.mxu1 %v2006_v13  ;;  %2009 = vmatprep.subr.bf16.mxu0 %v2008_v14  ;;  %v983_v13 = vld [vmem:[%s2782_s27 + $0x158] sm:$0xff]  ;;  %v2028_v17 = vpack.c.bf16 %v985_v12, %v981_v11 }
  0xf9   : > { %2137 = vmatprep.subr.bf16.mxu1 %v2136_v15  ;;  %v987_v14 = vld [vmem:[%s2782_s27 + $0x178] sm:$0xff]  ;;  %v2026_v15 = vpack.c.bf16 %v976_v7, %v972_v6  ;;  %v1018_v6 = vld [vmem:[%s2782_s27 + $0x270] sm:$0xff]  ;;  %v1021_v7 = vld [vmem:[%s2782_s27 + $0x288] sm:$0xff] }
  0xfa   : > { %706 = vmatmul.mubr.f32.vlgmr.msra.gmra.mrb[0].mxu0 %v282_v22  ;;  %v2156_v21 = vpack.c.bf16 %v987_v14, %v983_v13  ;;  %v2048_v13 = vpack.c.bf16 %v1025_v8, %v1021_v7  ;;  %v1020_v14 = vld [vmem:[%s2782_s27 + $0x280] sm:$0xff]  ;;  %v1063_v7 = vld [vmem:[%s2782_s27 + $0x3d8] sm:$0xff] }
  0xfb   : > { %884 = vmatmul.mubr.f32.vlgmr.msra.gmra.mrb[0].mxu1 %v282_v22  ;;  %711 = vmatprep.mubr.f32.mxu0 %v287_v25  ;;  %v986_v22 = vld [vmem:[%s2782_s27 + $0x170] sm:$0xff] }
  0xfc   : > { %889 = vmatprep.mubr.f32.mxu1 %v287_v25  ;;  %2011 = vmatpush1.bf16.msra.mxu0 %v2010_v26  ;;  %v991_v25 = vld [vmem:[%s2782_s27 + $0x198] sm:$0xff] }
  0xfd   : > { %2139 = vmatpush1.bf16.msra.mxu1 %v2138_v27  ;;  %2013 = vmatprep.subr.bf16.mxu0 %v2012_v28  ;;  %v995_v26 = vld [vmem:[%s2782_s27 + $0x1b8] sm:$0xff]  ;;  %v2030_v27 = vpack.c.bf16 %v984_v19, %v980_v18  ;;  %v2158_v28 = vpack.c.bf16 %v986_v22, %v982_v20  ;;  %v1026_v18 = vld [vmem:[%s2782_s27 + $0x2b0] sm:$0xff]  ;;  %v1029_v19 = vld [vmem:[%s2782_s27 + $0x2c8] sm:$0xff] }
  0xfe   : > { %712 = vmatmul.mubr.f32.gmra.mrb[2].mxu0 %v286_v36  ;;  %2141 = vmatprep.subr.bf16.mxu1 %v2140_v32  ;;  %v990_v32 = vld [vmem:[%s2782_s27 + $0x190] sm:$0xff]  ;;  %v2160_v33 = vpack.c.bf16 %v995_v26, %v991_v25  ;;  %v1033_v20 = vld [vmem:[%s2782_s27 + $0x2e8] sm:$0xff]  ;;  %v1035_v22 = vld [vmem:[%s2782_s27 + $0x2f8] sm:$0xff] }
  0xff   : > { %717 = vmatprep.mubr.f32.mxu0 %v291_v39  ;;  %890 = vmatmul.mubr.f32.gmra.mrb[2].mxu1 %v286_v36  ;;  %v1001_v36 = vld [vmem:[%s2782_s27 + $0x1e8] sm:$0xff]  ;;  %v2052_v25 = vpack.c.bf16 %v1033_v20, %v1029_v19  ;;  %v1028_v26 = vld [vmem:[%s2782_s27 + $0x2c0] sm:$0xff]  ;;  %v1071_v19 = vld [vmem:[%s2782_s27 + $0x418] sm:$0xff] }
 0x100   : > { %895 = vmatprep.mubr.f32.mxu1 %v291_v39  ;;  %2015 = vmatpush1.bf16.msra.mxu0 %v2014_v40  ;;  %v2034_v39 = vpack.c.bf16 %v992_v31, %v988_v30  ;;  %v2162_v40 = vpack.c.bf16 %v994_v34, %v990_v32  ;;  %v1034_v30 = vld [vmem:[%s2782_s27 + $0x2f0] sm:$0xff]  ;;  %v1037_v31 = vld [vmem:[%s2782_s27 + $0x308] sm:$0xff]  ;;  %v1043_v34 = vld [vmem:[%s2782_s27 + $0x338] sm:$0xff] }
 0x101   : > { %2143 = vmatpush1.bf16.msra.mxu1 %v2142_v41  ;;  %2017 = vmatprep.subr.bf16.mxu0 %v2016_v42  ;;  %v2036_v41 = vpack.c.bf16 %v1001_v36, %v997_v35  ;;  %v996_v42 = vld [vmem:[%s2782_s27 + $0x1c0] sm:$0xff]  ;;  %v1041_v32 = vld [vmem:[%s2782_s27 + $0x328] sm:$0xff] }
 0x102   : > { %718 = vmatmul.mubr.f32.gmra.mrb[4].mxu0 %v290_v50  ;;  %2145 = vmatprep.subr.bf16.mxu1 %v2144_v46  ;;  %v1002_v46 = vld [vmem:[%s2782_s27 + $0x1f0] sm:$0xff]  ;;  %v2038_v51 = vpack.c.bf16 %v1000_v43, %v996_v42  ;;  %v2056_v37 = vpack.c.bf16 %v1041_v32, %v1037_v31  ;;  %v1045_v43 = vld [vmem:[%s2782_s27 + $0x348] sm:$0xff]  ;;  %v1083_v31 = vld [vmem:[%s2782_s27 + $0x478] sm:$0xff] }
 0x103   : > { %723 = vmatprep.mubr.f32.mxu0 %v295_v53  ;;  %896 = vmatmul.mubr.f32.gmra.mrb[4].mxu1 %v290_v50  ;;  %v1011_v50 = vld [vmem:[%s2782_s27 + $0x238] sm:$0xff]  ;;  %v2166_v52 = vpack.c.bf16 %v1002_v46, %v998_v44  ;;  %v1042_v42 = vld [vmem:[%s2782_s27 + $0x330] sm:$0xff]  ;;  %v1049_v44 = vld [vmem:[%s2782_s27 + $0x368] sm:$0xff] }
 0x104   : > { %901 = vmatprep.mubr.f32.mxu1 %v295_v53  ;;  %2019 = vmatpush1.bf16.msra.mxu0 %v2018_v54  ;;  %v2040_v53 = vpack.c.bf16 %v1009_v48, %v1005_v47  ;;  %v1004_v54 = vld [vmem:[%s2782_s27 + $0x200] sm:$0xff]  ;;  %v2168_v57 = vpack.c.bf16 %v1011_v50, %v1007_v49  ;;  %v1051_v46 = vld [vmem:[%s2782_s27 + $0x378] sm:$0xff]  ;;  %v2060_v49 = vpack.c.bf16 %v1049_v44, %v1045_v43  ;;  %v1078_v43 = vld [vmem:[%s2782_s27 + $0x450] sm:$0xff] }
 0x105   : > { %2147 = vmatpush1.bf16.msra.mxu1 %v2146_v55  ;;  %2021 = vmatprep.subr.bf16.mxu0 %v2020_v56  ;;  %v1008_v55 = vld [vmem:[%s2782_s27 + $0x220] sm:$0xff]  ;;  %v1006_v56 = vld [vmem:[%s2782_s27 + $0x210] sm:$0xff] }
 0x106   : > { %724 = vmatmul.mubr.f32.gmra.mrb[6].mxu0 %v294_v0  ;;  %2149 = vmatprep.subr.bf16.mxu1 %v2148_v60  ;;  %v1017_v60 = vld [vmem:[%s2782_s27 + $0x268] sm:$0xff]  ;;  %v2042_v63 = vpack.c.bf16 %v1008_v55, %v1004_v54  ;;  %v1044_v50 = vld [vmem:[%s2782_s27 + $0x340] sm:$0xff]  ;;  %v1050_v54 = vld [vmem:[%s2782_s27 + $0x370] sm:$0xff] }
 0x107   : > { %902 = vmatmul.mubr.f32.gmra.mrb[6].mxu1 %v294_v0  ;;  %v2170_v0 = vpack.c.bf16 %v1010_v58, %v1006_v56  ;;  %v2044_v1 = vpack.c.bf16 %v1017_v60, %v1013_v59  ;;  %v1053_v55 = vld [vmem:[%s2782_s27 + $0x388] sm:$0xff]  ;;  %v1059_v58 = vld [vmem:[%s2782_s27 + $0x3b8] sm:$0xff]  ;;  %v1082_v44 = vld [vmem:[%s2782_s27 + $0x470] sm:$0xff] }
 0x108   : > { %2023 = vmatpush1.bf16.msra.mxu0 %v2022_v3  ;;  %v1016_v3 = vld [vmem:[%s2782_s27 + $0x260] sm:$0xff]  ;;  %v1057_v56 = vld [vmem:[%s2782_s27 + $0x3a8] sm:$0xff] }
 0x109   : > { %2151 = vmatpush1.bf16.msra.mxu1 %v2150_v4  ;;  %2025 = vmatprep.subr.bf16.mxu0 %v2024_v5  ;;  %v1014_v4 = vld [vmem:[%s2782_s27 + $0x250] sm:$0xff]  ;;  %v2172_v5 = vpack.c.bf16 %v1019_v62, %v1015_v61  ;;  %v2046_v11 = vpack.c.bf16 %v1016_v3, %v1012_v2  ;;  %v2064_v61 = vpack.c.bf16 %v1057_v56, %v1053_v55  ;;  %v1052_v62 = vld [vmem:[%s2782_s27 + $0x380] sm:$0xff] }
 0x10a   : > { %2153 = vmatprep.subr.bf16.mxu1 %v2152_v9  ;;  %v1023_v9 = vld [vmem:[%s2782_s27 + $0x298] sm:$0xff]  ;;  %v2174_v12 = vpack.c.bf16 %v1018_v6, %v1014_v4  ;;  %v1058_v2 = vld [vmem:[%s2782_s27 + $0x3b0] sm:$0xff]  ;;  %v1065_v6 = vld [vmem:[%s2782_s27 + $0x3e8] sm:$0xff] }
 0x10b   : > { %v1084_v55 = vld [vmem:[%s2782_s27 + $0x480] sm:$0xff] }
 0x10c   : > { %2027 = vmatpush1.bf16.msra.mxu0 %v2026_v15  ;;  %v1024_v15 = vld [vmem:[%s2782_s27 + $0x2a0] sm:$0xff] }
 0x10d   : > { %2155 = vmatpush1.bf16.msra.mxu1 %v2154_v16  ;;  %2029 = vmatprep.subr.bf16.mxu0 %v2028_v17  ;;  %v1022_v16 = vld [vmem:[%s2782_s27 + $0x290] sm:$0xff]  ;;  %v2176_v17 = vpack.c.bf16 %v1027_v10, %v1023_v9  ;;  %v2050_v23 = vpack.c.bf16 %v1024_v15, %v1020_v14  ;;  %v1067_v9 = vld [vmem:[%s2782_s27 + $0x3f8] sm:$0xff]  ;;  %v1060_v10 = vld [vmem:[%s2782_s27 + $0x3c0] sm:$0xff] }
 0x10e   : > { %2157 = vmatprep.subr.bf16.mxu1 %v2156_v21  ;;  %v1031_v21 = vld [vmem:[%s2782_s27 + $0x2d8] sm:$0xff]  ;;  %v2178_v24 = vpack.c.bf16 %v1026_v18, %v1022_v16  ;;  %v1062_v14 = vld [vmem:[%s2782_s27 + $0x3d0] sm:$0xff]  ;;  %v1073_v18 = vld [vmem:[%s2782_s27 + $0x428] sm:$0xff] }
 0x10f   : > { %v1066_v15 = vld [vmem:[%s2782_s27 + $0x3f0] sm:$0xff]  ;;  %v1088_v56 = vld [vmem:[%s2782_s27 + $0x4a0] sm:$0xff] }
 0x110   : > { %2031 = vmatpush1.bf16.msra.mxu0 %v2030_v27  ;;  %v1032_v27 = vld [vmem:[%s2782_s27 + $0x2e0] sm:$0xff]  ;;  %v2198_v16 = vpack.c.bf16 %v1066_v15, %v1062_v14  ;;  %v1094_v15 = vld [vmem:[%s2782_s27 + $0x4d0] sm:$0xff] }
 0x111   : > { %2159 = vmatpush1.bf16.msra.mxu1 %v2158_v28  ;;  %2033 = vmatprep.subr.bf16.mxu0 %v2032_v29  ;;  %v1030_v28 = vld [vmem:[%s2782_s27 + $0x2d0] sm:$0xff]  ;;  %v2180_v29 = vpack.c.bf16 %v1035_v22, %v1031_v21  ;;  %v2054_v35 = vpack.c.bf16 %v1032_v27, %v1028_v26  ;;  %v1075_v21 = vld [vmem:[%s2782_s27 + $0x438] sm:$0xff]  ;;  %v1077_v27 = vld [vmem:[%s2782_s27 + $0x448] sm:$0xff] }
 0x112   : > { %2161 = vmatprep.subr.bf16.mxu1 %v2160_v33  ;;  %v1039_v33 = vld [vmem:[%s2782_s27 + $0x318] sm:$0xff]  ;;  %v2182_v36 = vpack.c.bf16 %v1034_v30, %v1030_v28  ;;  %v2200_v22 = vpack.c.bf16 %v1075_v21, %v1071_v19  ;;  %v1074_v26 = vld [vmem:[%s2782_s27 + $0x430] sm:$0xff]  ;;  %v1096_v14 = vld [vmem:[%s2782_s27 + $0x4e0] sm:$0xff] }
 0x113   : > { %v1079_v30 = vld [vmem:[%s2782_s27 + $0x458] sm:$0xff] }
 0x114   : > { %2035 = vmatpush1.bf16.msra.mxu0 %v2034_v39  ;;  %v1040_v39 = vld [vmem:[%s2782_s27 + $0x320] sm:$0xff]  ;;  %v1103_v21 = vld [vmem:[%s2782_s27 + $0x518] sm:$0xff] }
 0x115   : > { %2163 = vmatpush1.bf16.msra.mxu1 %v2162_v40  ;;  %2037 = vmatprep.subr.bf16.mxu0 %v2036_v41  ;;  %v1038_v40 = vld [vmem:[%s2782_s27 + $0x310] sm:$0xff]  ;;  %v2184_v41 = vpack.c.bf16 %v1043_v34, %v1039_v33  ;;  %v2058_v47 = vpack.c.bf16 %v1040_v39, %v1036_v38  ;;  %v1076_v38 = vld [vmem:[%s2782_s27 + $0x440] sm:$0xff] }
 0x116   : > { %2165 = vmatprep.subr.bf16.mxu1 %v2164_v45  ;;  %v1047_v45 = vld [vmem:[%s2782_s27 + $0x358] sm:$0xff]  ;;  %v2186_v48 = vpack.c.bf16 %v1042_v42, %v1038_v40  ;;  %v1080_v39 = vld [vmem:[%s2782_s27 + $0x460] sm:$0xff]  ;;  %v2204_v42 = vpack.c.bf16 %v1083_v31, %v1079_v30  ;;  %v1102_v31 = vld [vmem:[%s2782_s27 + $0x510] sm:$0xff] }
 0x118   : > { %2039 = vmatpush1.bf16.msra.mxu0 %v2038_v51  ;;  %v1048_v51 = vld [vmem:[%s2782_s27 + $0x360] sm:$0xff] }
 0x119   : > { %2167 = vmatpush1.bf16.msra.mxu1 %v2166_v52  ;;  %2041 = vmatprep.subr.bf16.mxu0 %v2040_v53  ;;  %v1046_v52 = vld [vmem:[%s2782_s27 + $0x350] sm:$0xff]  ;;  %v2188_v53 = vpack.c.bf16 %v1051_v46, %v1047_v45  ;;  %v2062_v59 = vpack.c.bf16 %v1048_v51, %v1044_v50  ;;  %v1085_v45 = vld [vmem:[%s2782_s27 + $0x488] sm:$0xff] }
 0x11a   : > { %2169 = vmatprep.subr.bf16.mxu1 %v2168_v57  ;;  %v1055_v57 = vld [vmem:[%s2782_s27 + $0x398] sm:$0xff]  ;;  %v2190_v60 = vpack.c.bf16 %v1050_v54, %v1046_v52  ;;  %v2206_v54 = vpack.c.bf16 %v1082_v44, %v1078_v43  ;;  %v1108_v44 = vld [vmem:[%s2782_s27 + $0x540] sm:$0xff] }
 0x11c   : > { %2043 = vmatpush1.bf16.msra.mxu0 %v2042_v63  ;;  %v1056_v63 = vld [vmem:[%s2782_s27 + $0x3a0] sm:$0xff] }
 0x11d   : > { %2171 = vmatpush1.bf16.msra.mxu1 %v2170_v0  ;;  %2045 = vmatprep.subr.bf16.mxu0 %v2044_v1  ;;  %v2192_v0 = vpack.c.bf16 %v1059_v58, %v1055_v57  ;;  %v1054_v1 = vld [vmem:[%s2782_s27 + $0x390] sm:$0xff]  ;;  %v2066_v3 = vpack.c.bf16 %v1056_v63, %v1052_v62  ;;  %v1093_v63 = vld [vmem:[%s2782_s27 + $0x4c8] sm:$0xff] }
 0x11e   : > { %2173 = vmatprep.subr.bf16.mxu1 %v2172_v5  ;;  %v2194_v4 = vpack.c.bf16 %v1058_v2, %v1054_v1  ;;  %v1061_v5 = vld [vmem:[%s2782_s27 + $0x3c8] sm:$0xff]  ;;  %v1090_v62 = vld [vmem:[%s2782_s27 + $0x4b0] sm:$0xff]  ;;  %v1095_v2 = vld [vmem:[%s2782_s27 + $0x4d8] sm:$0xff] }
 0x11f   : > { %v2068_v8 = vpack.c.bf16 %v1065_v6, %v1061_v5  ;;  %v1097_v1 = vld [vmem:[%s2782_s27 + $0x4e8] sm:$0xff] }
 0x120   : > { %2047 = vmatpush1.bf16.msra.mxu0 %v2046_v11  ;;  %v1064_v11 = vld [vmem:[%s2782_s27 + $0x3e0] sm:$0xff] }
 0x121   : > { %2175 = vmatpush1.bf16.msra.mxu1 %v2174_v12  ;;  %2049 = vmatprep.subr.bf16.mxu0 %v2048_v13  ;;  %v2196_v12 = vpack.c.bf16 %v1067_v9, %v1063_v7  ;;  %v2070_v13 = vpack.c.bf16 %v1064_v11, %v1060_v10  ;;  %v2082_v7 = vpack.c.bf16 %v1088_v56, %v1084_v55  ;;  %v1092_v9 = vld [vmem:[%s2782_s27 + $0x4c0] sm:$0xff] }
 0x122   : > { %2177 = vmatprep.subr.bf16.mxu1 %v2176_v17  ;;  %v1069_v17 = vld [vmem:[%s2782_s27 + $0x408] sm:$0xff]  ;;  %v1116_v56 = vld [vmem:[%s2782_s27 + $0x580] sm:$0xff] }
 0x123   : > { %v2072_v20 = vpack.c.bf16 %v1073_v18, %v1069_v17  ;;  %v1101_v18 = vld [vmem:[%s2782_s27 + $0x508] sm:$0xff] }
 0x124   : > { %2051 = vmatpush1.bf16.msra.mxu0 %v2050_v23  ;;  %v1068_v23 = vld [vmem:[%s2782_s27 + $0x400] sm:$0xff] }
 0x125   : > { %2179 = vmatpush1.bf16.msra.mxu1 %v2178_v24  ;;  %2053 = vmatprep.subr.bf16.mxu0 %v2052_v25  ;;  %v1072_v24 = vld [vmem:[%s2782_s27 + $0x420] sm:$0xff]  ;;  %v1070_v25 = vld [vmem:[%s2782_s27 + $0x410] sm:$0xff] }
 0x126   : > { %2181 = vmatprep.subr.bf16.mxu1 %v2180_v29  ;;  %v1081_v29 = vld [vmem:[%s2782_s27 + $0x468] sm:$0xff] }
 0x128   : > { %2055 = vmatpush1.bf16.msra.mxu0 %v2054_v35 }
 0x129   : > { %2183 = vmatpush1.bf16.msra.mxu1 %v2182_v36  ;;  %2057 = vmatprep.subr.bf16.mxu0 %v2056_v37  ;;  %v2074_v36 = vpack.c.bf16 %v1072_v24, %v1068_v23  ;;  %v2202_v37 = vpack.c.bf16 %v1074_v26, %v1070_v25  ;;  %v2086_v25 = vpack.c.bf16 %v1096_v14, %v1092_v9  ;;  %v1137_v14 = vld [vmem:[%s2782_s27 + $0x628] sm:$0xff] }
 0x12a   : > { %2185 = vmatprep.subr.bf16.mxu1 %v2184_v41  ;;  %v2076_v41 = vpack.c.bf16 %v1081_v29, %v1077_v27  ;;  %v1100_v27 = vld [vmem:[%s2782_s27 + $0x500] sm:$0xff] }
 0x12c   : > { %2059 = vmatpush1.bf16.msra.mxu0 %v2058_v47  ;;  %v1089_v47 = vld [vmem:[%s2782_s27 + $0x4a8] sm:$0xff] }
 0x12d   : > { %2187 = vmatpush1.bf16.msra.mxu1 %v2186_v48  ;;  %2061 = vmatprep.subr.bf16.mxu0 %v2060_v49  ;;  %v1087_v48 = vld [vmem:[%s2782_s27 + $0x498] sm:$0xff] }
 0x12e   : > { %2189 = vmatprep.subr.bf16.mxu1 %v2188_v53  ;;  %v1091_v49 = vld [vmem:[%s2782_s27 + $0x4b8] sm:$0xff]  ;;  %v2078_v53 = vpack.c.bf16 %v1080_v39, %v1076_v38  ;;  %v1113_v38 = vld [vmem:[%s2782_s27 + $0x568] sm:$0xff] }
 0x12f   : > { %v1111_v39 = vld [vmem:[%s2782_s27 + $0x558] sm:$0xff] }
 0x130   : > { %2063 = vmatpush1.bf16.msra.mxu0 %v2062_v59  ;;  %v2080_v59 = vpack.c.bf16 %v1089_v47, %v1085_v45  ;;  %v1112_v45 = vld [vmem:[%s2782_s27 + $0x560] sm:$0xff] }
 0x131   : > { %2191 = vmatpush1.bf16.msra.mxu1 %v2190_v60  ;;  %2065 = vmatprep.subr.bf16.mxu0 %v2064_v61  ;;  %v2208_v60 = vpack.c.bf16 %v1091_v49, %v1087_v48  ;;  %v1086_v61 = vld [vmem:[%s2782_s27 + $0x490] sm:$0xff] }
 0x132   : > { %2193 = vmatprep.subr.bf16.mxu1 %v2192_v0  ;;  %v1110_v48 = vld [vmem:[%s2782_s27 + $0x550] sm:$0xff] }
 0x133   : > { %v1114_v49 = vld [vmem:[%s2782_s27 + $0x570] sm:$0xff] }
 0x134   : > { %2067 = vmatpush1.bf16.msra.mxu0 %v2066_v3  ;;  %v1099_v3 = vld [vmem:[%s2782_s27 + $0x4f8] sm:$0xff]  ;;  %v2222_v55 = vpack.c.bf16 %v1114_v49, %v1110_v48  ;;  %v1152_v48 = vld [vmem:[%s2782_s27 + $0x6a0] sm:$0xff] }
 0x135   : > { %2195 = vmatpush1.bf16.msra.mxu1 %v2194_v4  ;;  %2069 = vmatprep.subr.bf16.mxu0 %v2068_v8  ;;  %v2210_v8 = vpack.c.bf16 %v1090_v62, %v1086_v61  ;;  %v1118_v61 = vld [vmem:[%s2782_s27 + $0x590] sm:$0xff] }
 0x136   : > { %2197 = vmatprep.subr.bf16.mxu1 %v2196_v12  ;;  %v2084_v12 = vpack.c.bf16 %v1097_v1, %v1093_v63  ;;  %v1122_v62 = vld [vmem:[%s2782_s27 + $0x5b0] sm:$0xff]  ;;  %v1125_v63 = vld [vmem:[%s2782_s27 + $0x5c8] sm:$0xff]  ;;  %v1127_v1 = vld [vmem:[%s2782_s27 + $0x5d8] sm:$0xff] }
 0x138   : > { %2071 = vmatpush1.bf16.msra.mxu0 %v2070_v13  ;;  %v2212_v13 = vpack.c.bf16 %v1099_v3, %v1095_v2  ;;  %v1131_v2 = vld [vmem:[%s2782_s27 + $0x5f8] sm:$0xff] }
 0x139   : > { %2199 = vmatpush1.bf16.msra.mxu1 %v2198_v16  ;;  %2073 = vmatprep.subr.bf16.mxu0 %v2072_v20  ;;  %v1098_v16 = vld [vmem:[%s2782_s27 + $0x4f0] sm:$0xff]  ;;  %v1105_v20 = vld [vmem:[%s2782_s27 + $0x528] sm:$0xff]  ;;  %v2228_v9 = vpack.c.bf16 %v1131_v2, %v1127_v1 }
 0x13a   : > { %2201 = vmatprep.subr.bf16.mxu1 %v2200_v22  ;;  %v1107_v22 = vld [vmem:[%s2782_s27 + $0x538] sm:$0xff]  ;;  %v2214_v26 = vpack.c.bf16 %v1098_v16, %v1094_v15  ;;  %v1162_v1 = vld [vmem:[%s2782_s27 + $0x6f0] sm:$0xff]  ;;  %v1165_v2 = vld [vmem:[%s2782_s27 + $0x708] sm:$0xff] }
 0x13b   : > { %v1135_v15 = vld [vmem:[%s2782_s27 + $0x618] sm:$0xff] }
 0x13c   : > { %v1139_v16 = vld [vmem:[%s2782_s27 + $0x638] sm:$0xff] }
 0x1cd   : > { %v707_v28 = vpop.f32.mrb[0].mxu0 }
 0x1ce   : > { %v3181_v32 = vpop.f32.mrb[0].mxu1  ;;  %v709_v33 = vpop.f32.mrb[1].mxu0  ;;  %v908_v40 = vmax.f32 %v707_v28, 0.0  ;;  %v1104_v28 = vld [vmem:[%s2782_s27 + $0x520] sm:$0xff] }
 0x1cf   : > { %v909_v34 = vmax.f32 %v709_v33, 0.0  ;;  %v3183_v35 = vpop.f32.mrb[1].mxu1  ;;  %v1106_v33 = vld [vmem:[%s2782_s27 + $0x530] sm:$0xff] }
 0x1d0   : > { %v2218_v43 = vpack.c.bf16 %v1106_v33, %v1102_v31 }
 0x1d1   : > { %v713_v46 = vpop.f32.mrb[2].mxu0  ;;  %1260 = vmatprep.mubr.f32.mxu0 %v909_v34  ;;  %1438 = vmatprep.mubr.f32.mxu1 %v909_v34  ;;  %v1109_v34 = vld [vmem:[%s2782_s27 + $0x548] sm:$0xff] }
 0x1d2   : > { %v715_v50 = vpop.f32.mrb[3].mxu0  ;;  %1261 = vmatmul.mubr.f32.vlgmr.msra.gmra.mrb[8].mxu0 %v908_v40  ;;  %1439 = vmatmul.mubr.f32.vlgmr.msra.gmra.mrb[8].mxu1 %v908_v40  ;;  %v3193_v51 = vpop.f32.mrb[2].mxu1  ;;  %v912_v58 = vmax.f32 %v713_v46, 0.0  ;;  %v1115_v40 = vld [vmem:[%s2782_s27 + $0x578] sm:$0xff]  ;;  %v2092_v46 = vpack.c.bf16 %v1113_v38, %v1109_v34  ;;  %v1140_v34 = vld [vmem:[%s2782_s27 + $0x640] sm:$0xff] }
 0x1d3   : > { %v913_v52 = vmax.f32 %v715_v50, 0.0  ;;  %2075 = vmatpush1.bf16.msra.mxu0 %v2074_v36  ;;  %2203 = vmatpush1.bf16.msra.mxu1 %v2202_v37  ;;  %v3197_v57 = vpop.f32.mrb[3].mxu1  ;;  %v2088_v36 = vpack.c.bf16 %v1105_v20, %v1101_v18  ;;  %v2216_v37 = vpack.c.bf16 %v1107_v22, %v1103_v21  ;;  %v2220_v47 = vpack.c.bf16 %v1115_v40, %v1111_v39  ;;  %v1121_v50 = vld [vmem:[%s2782_s27 + $0x5a8] sm:$0xff]  ;;  %v1136_v20 = vld [vmem:[%s2782_s27 + $0x620] sm:$0xff]  ;;  %v1142_v39 = vld [vmem:[%s2782_s27 + $0x650] sm:$0xff] }
 0x1d4   : > { %2077 = vmatprep.subr.bf16.mxu0 %v2076_v41  ;;  %2205 = vmatprep.subr.bf16.mxu1 %v2204_v42  ;;  %v911_v41 = vmax.f32 %v3183_v35, 0.0  ;;  %v2090_v42 = vpack.c.bf16 %v1104_v28, %v1100_v27  ;;  %v1117_v35 = vld [vmem:[%s2782_s27 + $0x588] sm:$0xff]  ;;  %v2232_v22 = vpack.c.bf16 %v1139_v16, %v1135_v15  ;;  %v1143_v28 = vld [vmem:[%s2782_s27 + $0x658] sm:$0xff]  ;;  %v1146_v40 = vld [vmem:[%s2782_s27 + $0x670] sm:$0xff] }
 0x1d5   : > { %v719_v0 = vpop.f32.mrb[4].mxu0  ;;  %1266 = vmatprep.mubr.f32.mxu0 %v913_v52  ;;  %1444 = vmatprep.mubr.f32.mxu1 %v913_v52  ;;  %v1119_v52 = vld [vmem:[%s2782_s27 + $0x598] sm:$0xff]  ;;  %v1145_v27 = vld [vmem:[%s2782_s27 + $0x668] sm:$0xff]  ;;  %v1170_v15 = vld [vmem:[%s2782_s27 + $0x730] sm:$0xff] }
 0x1d6   : > { %v721_v4 = vpop.f32.mrb[5].mxu0  ;;  %1267 = vmatmul.mubr.f32.gmra.mrb[10].mxu0 %v912_v58  ;;  %1445 = vmatmul.mubr.f32.gmra.mrb[10].mxu1 %v912_v58  ;;  %v3205_v5 = vpop.f32.mrb[4].mxu1  ;;  %v916_v11 = vmax.f32 %v719_v0, 0.0  ;;  %v1120_v58 = vld [vmem:[%s2782_s27 + $0x5a0] sm:$0xff]  ;;  %v1129_v0 = vld [vmem:[%s2782_s27 + $0x5e8] sm:$0xff] }
 0x1d7   : > { %v917_v6 = vmax.f32 %v721_v4, 0.0  ;;  %2079 = vmatpush1.bf16.msra.mxu0 %v2078_v53  ;;  %2207 = vmatpush1.bf16.msra.mxu1 %v2206_v54  ;;  %v3208_v10 = vpop.f32.mrb[5].mxu1  ;;  %v1123_v53 = vld [vmem:[%s2782_s27 + $0x5b8] sm:$0xff]  ;;  %v2094_v54 = vpack.c.bf16 %v1112_v45, %v1108_v44  ;;  %v2098_v3 = vpack.c.bf16 %v1120_v58, %v1116_v56  ;;  %v2226_v4 = vpack.c.bf16 %v1122_v62, %v1118_v61  ;;  %v1160_v61 = vld [vmem:[%s2782_s27 + $0x6e0] sm:$0xff]  ;;  %v1173_v16 = vld [vmem:[%s2782_s27 + $0x748] sm:$0xff] }
 0x1d8   : > { %2081 = vmatprep.subr.bf16.mxu0 %v2080_v59  ;;  %2209 = vmatprep.subr.bf16.mxu1 %v2208_v60  ;;  %v2096_v59 = vpack.c.bf16 %v1121_v50, %v1117_v35  ;;  %v2224_v60 = vpack.c.bf16 %v1123_v53, %v1119_v52  ;;  %v1155_v44 = vld [vmem:[%s2782_s27 + $0x6b8] sm:$0xff]  ;;  %v1150_v50 = vld [vmem:[%s2782_s27 + $0x690] sm:$0xff]  ;;  %v1157_v53 = vld [vmem:[%s2782_s27 + $0x6c8] sm:$0xff] }
 0x1d9   : > { %v725_v17 = vpop.f32.mrb[6].mxu0  ;;  %1272 = vmatprep.mubr.f32.mxu0 %v917_v6  ;;  %1450 = vmatprep.mubr.f32.mxu1 %v917_v6  ;;  %v1124_v6 = vld [vmem:[%s2782_s27 + $0x5c0] sm:$0xff]  ;;  %v1154_v52 = vld [vmem:[%s2782_s27 + $0x6b0] sm:$0xff]  ;;  %v1163_v56 = vld [vmem:[%s2782_s27 + $0x6f8] sm:$0xff] }
 0x1da   : > { %v727_v19 = vpop.f32.mrb[7].mxu0  ;;  %1273 = vmatmul.mubr.f32.gmra.mrb[12].mxu0 %v916_v11  ;;  %1451 = vmatmul.mubr.f32.gmra.mrb[12].mxu1 %v916_v11  ;;  %v3217_v23 = vpop.f32.mrb[6].mxu1  ;;  %v920_v30 = vmax.f32 %v725_v17, 0.0  ;;  %v1126_v11 = vld [vmem:[%s2782_s27 + $0x5d0] sm:$0xff] }
 0x1db   : > { %v921_v24 = vmax.f32 %v727_v19, 0.0  ;;  %2083 = vmatpush1.bf16.msra.mxu0 %v2082_v7  ;;  %2211 = vmatpush1.bf16.msra.mxu1 %v2210_v8  ;;  %v3221_v29 = vpop.f32.mrb[7].mxu1  ;;  %v1128_v7 = vld [vmem:[%s2782_s27 + $0x5e0] sm:$0xff]  ;;  %v2100_v8 = vpack.c.bf16 %v1129_v0, %v1125_v63  ;;  %v1158_v0 = vld [vmem:[%s2782_s27 + $0x6d0] sm:$0xff] }
 0x1dc   : > { %2085 = vmatprep.subr.bf16.mxu0 %v2084_v12  ;;  %2213 = vmatprep.subr.bf16.mxu1 %v2212_v13  ;;  %v1130_v12 = vld [vmem:[%s2782_s27 + $0x5f0] sm:$0xff]  ;;  %v1133_v13 = vld [vmem:[%s2782_s27 + $0x608] sm:$0xff]  ;;  %v2102_v17 = vpack.c.bf16 %v1128_v7, %v1124_v6  ;;  %v1132_v19 = vld [vmem:[%s2782_s27 + $0x600] sm:$0xff] }
 0x1dd   : > { %1278 = vmatprep.mubr.f32.mxu0 %v921_v24  ;;  %1456 = vmatprep.mubr.f32.mxu1 %v921_v24  ;;  %v2230_v18 = vpack.c.bf16 %v1130_v12, %v1126_v11  ;;  %v2104_v21 = vpack.c.bf16 %v1137_v14, %v1133_v13  ;;  %v1134_v24 = vld [vmem:[%s2782_s27 + $0x610] sm:$0xff]  ;;  %v2106_v31 = vpack.c.bf16 %v1136_v20, %v1132_v19  ;;  %v1171_v6 = vld [vmem:[%s2782_s27 + $0x738] sm:$0xff]  ;;  %v1168_v11 = vld [vmem:[%s2782_s27 + $0x720] sm:$0xff] }
 0x1de   : > { %1279 = vmatmul.mubr.f32.gmra.mrb[14].mxu0 %v920_v30  ;;  %1457 = vmatmul.mubr.f32.gmra.mrb[14].mxu1 %v920_v30  ;;  %v1147_v30 = vld [vmem:[%s2782_s27 + $0x678] sm:$0xff]  ;;  %v1166_v14 = vld [vmem:[%s2782_s27 + $0x710] sm:$0xff] }
 0x1df   : > { %2087 = vmatpush1.bf16.msra.mxu0 %v2086_v25  ;;  %2215 = vmatpush1.bf16.msra.mxu1 %v2214_v26  ;;  %v1138_v25 = vld [vmem:[%s2782_s27 + $0x630] sm:$0xff]  ;;  %v1141_v26 = vld [vmem:[%s2782_s27 + $0x648] sm:$0xff]  ;;  %v2236_v38 = vpack.c.bf16 %v1147_v30, %v1143_v28  ;;  %v1179_v19 = vld [vmem:[%s2782_s27 + $0x778] sm:$0xff] }
 0x1e0   : > { %1349 = vmatprep.mubr.f32.mxu0 %v911_v41  ;;  %1527 = vmatprep.mubr.f32.mxu1 %v911_v41  ;;  %v2234_v33 = vpack.c.bf16 %v1138_v25, %v1134_v24  ;;  %v1149_v41 = vld [vmem:[%s2782_s27 + $0x688] sm:$0xff]  ;;  %v1176_v24 = vld [vmem:[%s2782_s27 + $0x760] sm:$0xff]  ;;  %v1178_v28 = vld [vmem:[%s2782_s27 + $0x770] sm:$0xff] }
 0x1e1   : > { %2089 = vmatprep.subr.bf16.mxu0 %v2088_v36  ;;  %2217 = vmatprep.subr.bf16.mxu1 %v2216_v37  ;;  %v1144_v36 = vld [vmem:[%s2782_s27 + $0x660] sm:$0xff]  ;;  %v2108_v37 = vpack.c.bf16 %v1145_v27, %v1141_v26  ;;  %v1174_v27 = vld [vmem:[%s2782_s27 + $0x750] sm:$0xff]  ;;  %v1181_v30 = vld [vmem:[%s2782_s27 + $0x788] sm:$0xff] }
 0x1e2   : > { %v2110_v45 = vpack.c.bf16 %v1144_v36, %v1140_v34  ;;  %v1187_v34 = vld [vmem:[%s2782_s27 + $0x7b8] sm:$0xff] }
 0x1e3   : > { %2091 = vmatpush1.bf16.msra.mxu0 %v2090_v42  ;;  %2219 = vmatpush1.bf16.msra.mxu1 %v2218_v43  ;;  %v1153_v42 = vld [vmem:[%s2782_s27 + $0x6a8] sm:$0xff]  ;;  %v1151_v43 = vld [vmem:[%s2782_s27 + $0x698] sm:$0xff] }
 0x1e4   : > { %2093 = vmatprep.subr.bf16.mxu0 %v2092_v46  ;;  %2221 = vmatprep.subr.bf16.mxu1 %v2220_v47  ;;  %v2238_v46 = vpack.c.bf16 %v1146_v40, %v1142_v39  ;;  %v1148_v47 = vld [vmem:[%s2782_s27 + $0x680] sm:$0xff]  ;;  %v2112_v49 = vpack.c.bf16 %v1153_v42, %v1149_v41  ;;  %v2240_v35 = vpack.c.bf16 %v1155_v44, %v1151_v43  ;;  %v1182_v42 = vld [vmem:[%s2782_s27 + $0x790] sm:$0xff]  ;;  %v1189_v44 = vld [vmem:[%s2782_s27 + $0x7c8] sm:$0xff] }
 0x1e5   : > { %v2114_v58 = vpack.c.bf16 %v1152_v48, %v1148_v47  ;;  %v1184_v39 = vld [vmem:[%s2782_s27 + $0x7a0] sm:$0xff]  ;;  %v1186_v43 = vld [vmem:[%s2782_s27 + $0x7b0] sm:$0xff]  ;;  %v1195_v47 = vld [vmem:[%s2782_s27 + $0x7f8] sm:$0xff] }
 0x1e7   : > { %2095 = vmatpush1.bf16.msra.mxu0 %v2094_v54  ;;  %2223 = vmatpush1.bf16.msra.mxu1 %v2222_v55  ;;  %v1161_v54 = vld [vmem:[%s2782_s27 + $0x6e8] sm:$0xff]  ;;  %v1159_v55 = vld [vmem:[%s2782_s27 + $0x6d8] sm:$0xff] }
 0x1e8   : > { %2097 = vmatprep.subr.bf16.mxu0 %v2096_v59  ;;  %2225 = vmatprep.subr.bf16.mxu1 %v2224_v60  ;;  %v2242_v59 = vpack.c.bf16 %v1154_v52, %v1150_v50  ;;  %v1156_v60 = vld [vmem:[%s2782_s27 + $0x6c0] sm:$0xff]  ;;  %v2116_v62 = vpack.c.bf16 %v1161_v54, %v1157_v53  ;;  %v2244_v63 = vpack.c.bf16 %v1163_v56, %v1159_v55  ;;  %v1190_v54 = vld [vmem:[%s2782_s27 + $0x7d0] sm:$0xff] }
 0x1e9   : > { %v2118_v7 = vpack.c.bf16 %v1160_v61, %v1156_v60  ;;  %v1192_v53 = vld [vmem:[%s2782_s27 + $0x7e0] sm:$0xff]  ;;  %v1194_v55 = vld [vmem:[%s2782_s27 + $0x7f0] sm:$0xff]  ;;  %v915_v60 = vmax.f32 %v3197_v57, 0.0  ;;  %v914_v61 = vmax.f32 %v3193_v51, 0.0 }
 0x1ea   : > { %v924_v57 = vld [vmem:[#allocation2] sm:$0xff]  ;;  %v926_v51 = vld [vmem:[#allocation2 + $0x10] sm:$0xff] }
 0x1eb   : > { %2099 = vmatpush1.bf16.msra.mxu0 %v2098_v3  ;;  %2227 = vmatpush1.bf16.msra.mxu1 %v2226_v4  ;;  %v1169_v3 = vld [vmem:[%s2782_s27 + $0x728] sm:$0xff]  ;;  %v1167_v4 = vld [vmem:[%s2782_s27 + $0x718] sm:$0xff] }
 0x1ec   : > { %2101 = vmatprep.subr.bf16.mxu0 %v2100_v8  ;;  %2229 = vmatprep.subr.bf16.mxu1 %v2228_v9  ;;  %v2246_v8 = vpack.c.bf16 %v1162_v1, %v1158_v0  ;;  %v1164_v9 = vld [vmem:[%s2782_s27 + $0x700] sm:$0xff]  ;;  %v2120_v12 = vpack.c.bf16 %v1169_v3, %v1165_v2  ;;  %v2248_v13 = vpack.c.bf16 %v1171_v6, %v1167_v4  ;;  %v923_v0 = vmax.f32 %v3221_v29, 0.0  ;;  %v925_v1 = vld [vmem:[#allocation2 + $0x8] sm:$0xff] }
 0x1ed   : > { %v2122_v20 = vpack.c.bf16 %v1168_v11, %v1164_v9  ;;  %v928_v9 = vld [vmem:[#allocation2 + $0x20] sm:$0xff]  ;;  %v930_v11 = vld [vmem:[#allocation2 + $0x30] sm:$0xff] }
 0x1ef   : > { %2103 = vmatpush1.bf16.msra.mxu0 %v2102_v17  ;;  %2231 = vmatpush1.bf16.msra.mxu1 %v2230_v18  ;;  %v1177_v17 = vld [vmem:[%s2782_s27 + $0x768] sm:$0xff]  ;;  %v1175_v18 = vld [vmem:[%s2782_s27 + $0x758] sm:$0xff] }
 0x1f0   : > { %2105 = vmatprep.subr.bf16.mxu0 %v2104_v21  ;;  %2233 = vmatprep.subr.bf16.mxu1 %v2232_v22  ;;  %v2250_v21 = vpack.c.bf16 %v1170_v15, %v1166_v14  ;;  %v1172_v22 = vld [vmem:[%s2782_s27 + $0x740] sm:$0xff]  ;;  %v2124_v25 = vpack.c.bf16 %v1177_v17, %v1173_v16  ;;  %v2252_v26 = vpack.c.bf16 %v1179_v19, %v1175_v18 }
 0x1f1   : > { %v2126_v36 = vpack.c.bf16 %v1176_v24, %v1172_v22  ;;  %v934_v22 = vld [vmem:[#allocation2 + $0x50] sm:$0xff]  ;;  %v933_v24 = vld [vmem:[#allocation2 + $0x48] sm:$0xff] }
 0x1f3   : > { %2107 = vmatpush1.bf16.msra.mxu0 %v2106_v31  ;;  %2235 = vmatpush1.bf16.msra.mxu1 %v2234_v33  ;;  %v1185_v31 = vld [vmem:[%s2782_s27 + $0x7a8] sm:$0xff]  ;;  %v1183_v33 = vld [vmem:[%s2782_s27 + $0x798] sm:$0xff] }
 0x1f4   : > { %2109 = vmatprep.subr.bf16.mxu0 %v2108_v37  ;;  %2237 = vmatprep.subr.bf16.mxu1 %v2236_v38  ;;  %v2254_v37 = vpack.c.bf16 %v1178_v28, %v1174_v27  ;;  %v1180_v38 = vld [vmem:[%s2782_s27 + $0x780] sm:$0xff]  ;;  %v2128_v40 = vpack.c.bf16 %v1185_v31, %v1181_v30  ;;  %v2256_v41 = vpack.c.bf16 %v1187_v34, %v1183_v33 }
 0x1f5   : > { %v2130_v48 = vpack.c.bf16 %v1184_v39, %v1180_v38  ;;  %v938_v38 = vld [vmem:[#allocation2 + $0x70] sm:$0xff]  ;;  %v937_v39 = vld [vmem:[#allocation2 + $0x68] sm:$0xff] }
 0x1f7   : > { %2111 = vmatpush1.bf16.msra.mxu0 %v2110_v45  ;;  %2239 = vmatpush1.bf16.msra.mxu1 %v2238_v46  ;;  %v1193_v45 = vld [vmem:[%s2782_s27 + $0x7e8] sm:$0xff]  ;;  %v1191_v46 = vld [vmem:[%s2782_s27 + $0x7d8] sm:$0xff] }
 0x1f8   : > { %2113 = vmatprep.subr.bf16.mxu0 %v2112_v49  ;;  %2241 = vmatprep.subr.bf16.mxu1 %v2240_v35  ;;  %v2258_v49 = vpack.c.bf16 %v1186_v43, %v1182_v42  ;;  %v1188_v35 = vld [vmem:[%s2782_s27 + $0x7c0] sm:$0xff]  ;;  %v2132_v50 = vpack.c.bf16 %v1193_v45, %v1189_v44  ;;  %v2260_v52 = vpack.c.bf16 %v1195_v47, %v1191_v46 }
 0x1f9   : > { %v2134_v56 = vpack.c.bf16 %v1192_v53, %v1188_v35 }
 0x1fb   : > { %2115 = vmatpush1.bf16.msra.mxu0 %v2114_v58  ;;  %2243 = vmatpush1.bf16.msra.mxu1 %v2242_v59  ;;  %v2262_v58 = vpack.c.bf16 %v1194_v55, %v1190_v54  ;;  %v910_v59 = vmax.f32 %v3181_v32, 0.0  ;;  %v922_v32 = vmax.f32 %v3217_v23, 0.0  ;;  %v931_v23 = vld [vmem:[#allocation2 + $0x38] sm:$0xff] }
 0x1fc   : > { %2117 = vmatprep.subr.bf16.mxu0 %v2116_v62  ;;  %2245 = vmatprep.subr.bf16.mxu1 %v2244_v63  ;;  %v919_v62 = vmax.f32 %v3208_v10, 0.0  ;;  %v918_v63 = vmax.f32 %v3205_v5, 0.0  ;;  %v927_v10 = vld [vmem:[#allocation2 + $0x18] sm:$0xff] }
 0x1ff   : > { %2119 = vmatpush1.bf16.msra.mxu0 %v2118_v7  ;;  %2247 = vmatpush1.bf16.msra.mxu1 %v2246_v8 }
 0x200   : > { %2121 = vmatprep.subr.bf16.mxu0 %v2120_v12  ;;  %2249 = vmatprep.subr.bf16.mxu1 %v2248_v13  ;;  %v929_v12 = vld [vmem:[#allocation2 + $0x28] sm:$0xff] }
 0x203   : > { %2123 = vmatpush1.bf16.msra.mxu0 %v2122_v20  ;;  %2251 = vmatpush1.bf16.msra.mxu1 %v2250_v21  ;;  %v932_v21 = vld [vmem:[#allocation2 + $0x40] sm:$0xff] }
 0x204   : > { %2125 = vmatprep.subr.bf16.mxu0 %v2124_v25  ;;  %2253 = vmatprep.subr.bf16.mxu1 %v2252_v26  ;;  %v935_v25 = vld [vmem:[#allocation2 + $0x58] sm:$0xff] }
 0x207   : > { %2127 = vmatpush1.bf16.msra.mxu0 %v2126_v36  ;;  %2255 = vmatpush1.bf16.msra.mxu1 %v2254_v37  ;;  %v936_v37 = vld [vmem:[#allocation2 + $0x60] sm:$0xff] }
 0x208   : > { %2129 = vmatprep.subr.bf16.mxu0 %v2128_v40  ;;  %2257 = vmatprep.subr.bf16.mxu1 %v2256_v41  ;;  %v939_v40 = vld [vmem:[#allocation2 + $0x78] sm:$0xff] }
 0x20b   : > { %2131 = vmatpush1.bf16.msra.mxu0 %v2130_v48  ;;  %2259 = vmatpush1.bf16.msra.mxu1 %v2258_v49 }
 0x20c   : > { %2133 = vmatprep.subr.bf16.mxu0 %v2132_v50  ;;  %2261 = vmatprep.subr.bf16.mxu1 %v2260_v52 }
 0x20f   : > { %2135 = vmatpush1.bf16.msra.mxu0 %v2134_v56  ;;  %2263 = vmatpush1.bf16.msra.mxu1 %v2262_v58 }
 0x212   : > { %1350 = vmatmul.mubr.f32.vlgmr.msra.gmra.mrb[8].mxu0 %v910_v59  ;;  %1528 = vmatmul.mubr.f32.vlgmr.msra.gmra.mrb[8].mxu1 %v910_v59 }
 0x213   : > { %1355 = vmatprep.mubr.f32.mxu0 %v915_v60  ;;  %1533 = vmatprep.mubr.f32.mxu1 %v915_v60 }
 0x216   : > { %1356 = vmatmul.mubr.f32.gmra.mrb[10].mxu0 %v914_v61  ;;  %1534 = vmatmul.mubr.f32.gmra.mrb[10].mxu1 %v914_v61 }
 0x217   : > { %1361 = vmatprep.mubr.f32.mxu0 %v919_v62  ;;  %1539 = vmatprep.mubr.f32.mxu1 %v919_v62 }
 0x21a   : > { %1362 = vmatmul.mubr.f32.gmra.mrb[12].mxu0 %v918_v63  ;;  %1540 = vmatmul.mubr.f32.gmra.mrb[12].mxu1 %v918_v63 }
 0x21b   : > { %1367 = vmatprep.mubr.f32.mxu0 %v923_v0  ;;  %1545 = vmatprep.mubr.f32.mxu1 %v923_v0 }
 0x21e   : > { %1368 = vmatmul.mubr.f32.gmra.mrb[14].mxu0 %v922_v32  ;;  %1546 = vmatmul.mubr.f32.gmra.mrb[14].mxu1 %v922_v32 }
 0x2e5   : > { %v1351_v2 = vpop.f32.mrb[8].mxu0  ;;  %v1529_v3 = vpop.f32.mrb[8].mxu1 }
 0x2e6   : > { %v1552_v4 = vadd.f32 %v1351_v2, %v924_v57  ;;  %v1554_v6 = vadd.f32 %v1529_v3, %v926_v51  ;;  %v1353_v7 = vpop.f32.mrb[9].mxu0  ;;  %v1531_v5 = vpop.f32.mrb[9].mxu1 }
 0x2e7   : > { %v1553_v8 = vadd.f32 %v1353_v7, %v925_v1  ;;  %v1555_v29 = vadd.f32 %v1531_v5, %v927_v10 }
 0x2e8   : > { %1568 = vst [vmem:[#allocation2] sm:$0xff] %v1552_v4  ;;  %1570 = vst [vmem:[#allocation2 + $0x10] sm:$0xff] %v1554_v6 }
 0x2e9   : > { %1569 = vst [vmem:[#allocation2 + $0x8] sm:$0xff] %v1553_v8  ;;  %1571 = vst [vmem:[#allocation2 + $0x18] sm:$0xff] %v1555_v29  ;;  %v1357_v13 = vpop.f32.mrb[10].mxu0  ;;  %v1535_v14 = vpop.f32.mrb[10].mxu1 }
 0x2ea   : > { %v1556_v15 = vadd.f32 %v1357_v13, %v928_v9  ;;  %v1558_v16 = vadd.f32 %v1535_v14, %v930_v11  ;;  %v1359_v17 = vpop.f32.mrb[11].mxu0  ;;  %v1537_v18 = vpop.f32.mrb[11].mxu1 }
 0x2eb   : > { %v1557_v19 = vadd.f32 %v1359_v17, %v929_v12  ;;  %v1559_v20 = vadd.f32 %v1537_v18, %v931_v23 }
 0x2ec   : > { %1572 = vst [vmem:[#allocation2 + $0x20] sm:$0xff] %v1556_v15  ;;  %1574 = vst [vmem:[#allocation2 + $0x30] sm:$0xff] %v1558_v16 }
 0x2ed   : > { %1573 = vst [vmem:[#allocation2 + $0x28] sm:$0xff] %v1557_v19  ;;  %1575 = vst [vmem:[#allocation2 + $0x38] sm:$0xff] %v1559_v20  ;;  %v1363_v26 = vpop.f32.mrb[12].mxu0  ;;  %v1541_v27 = vpop.f32.mrb[12].mxu1 }
 0x2ee   : > { %v1560_v28 = vadd.f32 %v1363_v26, %v932_v21  ;;  %v1562_v30 = vadd.f32 %v1541_v27, %v934_v22  ;;  %v1365_v31 = vpop.f32.mrb[13].mxu0  ;;  %v1543_v33 = vpop.f32.mrb[13].mxu1 }
 0x2ef   : > { %v1561_v34 = vadd.f32 %v1365_v31, %v933_v24  ;;  %v1563_v36 = vadd.f32 %v1543_v33, %v935_v25  ;;  %1587 = sbr.rel (%p1744_p11) target bundleno = 766 (0x2fe), region = 52  ;;  %v1588_v49 = vld [vmem:[#allocation2] sm:$0xff] (!%p1744_p11)  ;;  %v1590_v50 = vld [vmem:[#allocation2 + $0x10] sm:$0xff] (!%p1744_p11) }
 0x2f0   : > { %1576 = vst [vmem:[#allocation2 + $0x40] sm:$0xff] %v1560_v28  ;;  %1578 = vst [vmem:[#allocation2 + $0x50] sm:$0xff] %v1562_v30  ;;  %v1589_v35 = vld [vmem:[#allocation2 + $0x8] sm:$0xff] (!%p1744_p11)  ;;  %v1591_v52 = vld [vmem:[#allocation2 + $0x18] sm:$0xff] (!%p1744_p11) }
 0x2f1   : > { %1577 = vst [vmem:[#allocation2 + $0x48] sm:$0xff] %v1561_v34  ;;  %1579 = vst [vmem:[#allocation2 + $0x58] sm:$0xff] %v1563_v36  ;;  %v1369_v41 = vpop.f32.mrb[14].mxu0  ;;  %v1547_v42 = vpop.f32.mrb[14].mxu1 }
 0x2f2   : > { %v1564_v43 = vadd.f32 %v1369_v41, %v936_v37  ;;  %v1566_v44 = vadd.f32 %v1547_v42, %v938_v38  ;;  %v1371_v45 = vpop.f32.mrb[15].mxu0  ;;  %v1549_v46 = vpop.f32.mrb[15].mxu1  ;;  %1604 = vst [vmem:[#allocation9] sm:$0xff] (!%p1744_p11), %v1588_v49  ;;  %1605 = vst [vmem:[#allocation9 + $0x8] sm:$0xff] (!%p1744_p11), %v1589_v35 }
 0x2f3   : > { %v1565_v47 = vadd.f32 %v1371_v45, %v937_v39  ;;  %v1567_v48 = vadd.f32 %v1549_v46, %v939_v40  ;;  %1606 = vst [vmem:[#allocation9 + $0x10] sm:$0xff] (!%p1744_p11), %v1590_v50  ;;  %v1592_v53 = vld [vmem:[#allocation2 + $0x20] sm:$0xff] (!%p1744_p11)  ;;  %1607 = vst [vmem:[#allocation9 + $0x18] sm:$0xff] (!%p1744_p11), %v1591_v52  ;;  %v1594_v55 = vld [vmem:[#allocation2 + $0x30] sm:$0xff] (!%p1744_p11) }
 0x2f4   : > { %1580 = vst [vmem:[#allocation2 + $0x60] sm:$0xff] %v1564_v43  ;;  %1582 = vst [vmem:[#allocation2 + $0x70] sm:$0xff] %v1566_v44  ;;  %v1593_v54 = vld [vmem:[#allocation2 + $0x28] sm:$0xff] (!%p1744_p11)  ;;  %v1595_v56 = vld [vmem:[#allocation2 + $0x38] sm:$0xff] (!%p1744_p11) }
 0x2f5   : > { %1581 = vst [vmem:[#allocation2 + $0x68] sm:$0xff] %v1565_v47  ;;  %1583 = vst [vmem:[#allocation2 + $0x78] sm:$0xff] %v1567_v48 }
 0x2f6   : > { %1608 = vst [vmem:[#allocation9 + $0x20] sm:$0xff] %v1592_v53  ;;  %1609 = vst [vmem:[#allocation9 + $0x28] sm:$0xff] %v1593_v54 }
 0x2f7   : > { %v1596_v58 = vld [vmem:[#allocation2 + $0x40] sm:$0xff]  ;;  %1610 = vst [vmem:[#allocation9 + $0x30] sm:$0xff] %v1594_v55  ;;  %1611 = vst [vmem:[#allocation9 + $0x38] sm:$0xff] %v1595_v56  ;;  %v1598_v60 = vld [vmem:[#allocation2 + $0x50] sm:$0xff] }
 0x2f8   : > { %1612 = vst [vmem:[#allocation9 + $0x40] sm:$0xff] %v1596_v58  ;;  %v1597_v59 = vld [vmem:[#allocation2 + $0x48] sm:$0xff]  ;;  %v1599_v61 = vld [vmem:[#allocation2 + $0x58] sm:$0xff]  ;;  %1614 = vst [vmem:[#allocation9 + $0x50] sm:$0xff] %v1598_v60 }
 0x2f9   : > { %1613 = vst [vmem:[#allocation9 + $0x48] sm:$0xff] %v1597_v59  ;;  %1615 = vst [vmem:[#allocation9 + $0x58] sm:$0xff] %v1599_v61 }
 0x2fb   : > { %v1600_v62 = vld [vmem:[#allocation2 + $0x60] sm:$0xff]  ;;  %v1602_v0 = vld [vmem:[#allocation2 + $0x70] sm:$0xff] }
 0x2fc   : > { %v1601_v63 = vld [vmem:[#allocation2 + $0x68] sm:$0xff]  ;;  %1616 = vst [vmem:[#allocation9 + $0x60] sm:$0xff] %v1600_v62  ;;  %1618 = vst [vmem:[#allocation9 + $0x70] sm:$0xff] %v1602_v0  ;;  %v1603_v32 = vld [vmem:[#allocation2 + $0x78] sm:$0xff] }
 0x2fd   : > { %1617 = vst [vmem:[#allocation9 + $0x68] sm:$0xff] %v1601_v63  ;;  %1619 = vst [vmem:[#allocation9 + $0x78] sm:$0xff] %v1603_v32 }
 0x2fe PF: > { %p2322_p1 = scmp.eq.s32.totalorder %s2681_s30, 3  ;;  %s2561_s15 = smov [#allocation9]  }
 0x2ff   : > { %s1630_s28 = sshll.u32 %s2561_s15, 4  ;;  %s1631_s28 = int_to_ptr.vmem [resolvable:$true] %s1630_s28 }
 0x300   : > { %s2468_s7 = scalar_lea.vmem %s1631_s28, 2048  ;;  %p2475_p9 = scmp.lt.s32.totalorder %s1631_s28, %s1631_s28 }
 0x301   : > { %p2469_p6 = scmp.ne.s32.totalorder %s1631_s28, %s2468_s7  ;;  %p2476_p12 = scmp.lt.s32.totalorder %s2468_s7, %s2468_s7 }
 0x303   : > { %p2470_p4 = pnand %p2469_p6, %p2322_p1  ;;  %p2477_p10 = por %p2476_p12, %p2475_p9 }
 0x305   : > { %p2471_p7 = pneg %p2470_p4 }
 0x307   : > { %p2478_p0 = pnand %p2477_p10, %p2471_p7 }
 0x309   : > { %2481 = shalt.err (!%p2478_p0)
}
 0x30a   : > { %s2482_s26 = scalar_lea.hbm %s3366_s3, 2048 }
 0x30b   : > { %p2483_p8 = scmp.ne.s32.totalorder %s3366_s3, %s2482_s26  ;;  %p2488_p3 = scmp.lt.u32.totalorder %s2482_s26, %s3366_s3 }
 0x30d   : > { %p2484_p13 = pnand %p2483_p8, %p2322_p1 }
 0x30f   : > { %p2485_p2 = pneg %p2484_p13 }
 0x311   : > { %p2490_p5 = pnand %p2488_p3, %p2485_p2 }
 0x313   : > { %2493 = shalt.err (!%p2490_p5)
}
 0x314   : > { %s2562_s9 = smov 512   ;;  %s2563_s6 = smov 32  }
 0x315   : > { %2305 = dma.vmem_to_hbm [thread:$0]  (%p2322_p1), %s1631_s28, 2048, %s3366_s3, [#allocation5], %s2562_s9, %s2562_s9, %s2563_s6  }
 0x316   : > { %2527 = dma.done.wait (%p2322_p1), [#allocation5], 2048  }
 0x317   : > { %2529 = vsyncadd (%p2322_p1), [#allocation5], 4294965248 }
 0x318 PF: > { %s18_s17 = sadd.s32 1, %s2552_s17   ;;  %s3379_s12 = smov %s2536_s13 }
 0x319   : > { %p15_p11 = scmp.ge.s32.totalorder %s18_s17, 6   ;;  %s3380_s13 = smov %s2540_s14 }
 0x31a   : > { %s3381_s14 = smov %s2631_s24  ;;  %s3382_s15 = smov %s2548_s16 }
 0x31b   : > { %s3383_s16 = smov %s3385_s18  ;;  %17 = sbr.rel (!%p15_p11) target bundleno = 6 (0x6), region = 95 }
 0x322   :  { %1646 = vsyncpa [#allocation4], 1 }
 0x323   :  { %1648 = vsyncpa [#allocation4 + $0x1], 1 }
 0x324   :  { %1649 = vsyncpa [#allocation7], 1 }
 0x325   :  { %1651 = vsyncpa [#allocation7 + $0x1], 1 }
 0x326   :  { %1652 = vsyncpa [#allocation5], 1 }
 0x327   :  { %1654 = vsyncpa [#allocation5 + $0x1], 1 }

</bundles_post_ra>
